<compile_context>
chip_gen: v5e
topology: v5e:2x2
jax: 0.10.0
libtpu: 0.0.40
codegen_flags: <defaults>
</compile_context>

<pallas_src>
import functools
import math

import jax
import jax.numpy as jnp
import numpy as np
from jax.experimental import pallas as pl
from jax.experimental.pallas import tpu as pltpu

# ----------------------- small synthetic config ------------------------------
HIDDEN = 256
NUM_HEADS = 4
Q_LORA_RANK = 64
KV_LORA_RANK = 128
QK_NOPE_HEAD_DIM = 64
QK_ROPE_HEAD_DIM = 32           # must be even (rotate_half)
V_HEAD_DIM = 64
Q_HEAD_DIM = QK_NOPE_HEAD_DIM + QK_ROPE_HEAD_DIM
Q_LEN = 16
ROPE_SCALING = {"factor": 40.0, "mscale_all_dim": 1.0}
RMS_EPS = 1e-6

NUM_HEAD_GROUPS = 2                          # "parallel" grid axis (v7x: 1 group / TC)
HEADS_PER_GROUP = NUM_HEADS // NUM_HEAD_GROUPS


def yarn_get_mscale(scale=1.0, mscale=1.0):
    if scale <= 1:
        return 1.0
    return 0.1 * mscale * math.log(scale) + 1.0


def softmax_scale():
    scale = Q_HEAD_DIM ** -0.5
    if ROPE_SCALING is not None and ROPE_SCALING.get("mscale_all_dim", 0):
        m = yarn_get_mscale(ROPE_SCALING["factor"], ROPE_SCALING["mscale_all_dim"])
        scale = scale * m * m
    return scale


# ------------------------------ fused kernel ----------------------------------
def _rms_f32(x, w):
    var = jnp.mean(x * x, axis=-1, keepdims=True)
    return x * jax.lax.rsqrt(var + RMS_EPS) * w


def _fused_mla_kernel(h_ref, cosq_ref, sinq_ref, cosk_ref, sink_ref,
                      qa_w_ref, qa_ln_ref,
                      kva_lat_ref, kva_pe_ref, kva_ln_ref,
                      qb_nope_ref, qb_pe_ref, kc_ref, vo_ref,
                      out_ref, *, heads_per_group, rope_half, kv_lora):
    f32, bf16 = jnp.float32, jnp.bfloat16
    s_len = h_ref.shape[0]

    def dot(a, b):
        return jnp.dot(a, b, preferred_element_type=f32)

    def dot_nt(a, b):          # a:[M,K] x b:[N,K] -> [M,N]; MXU streams RHS transposed
        return jax.lax.dot_general(a, b, (((1,), (1,)), ((), ())),
                                   preferred_element_type=f32)

    h = h_ref[...].astype(bf16)                                      # [S, hidden]

    # ---- shared kv path: RMS-normed latent "values" + rotated rope key -------
    v_lat = _rms_f32(dot(h, kva_lat_ref[...]), kva_ln_ref[...])      # [S, kv_lora] f32
    k_pe = dot(h, kva_pe_ref[...])                                   # [S, 2*rh] f32
    c1k, c2k = cosk_ref[:, :rope_half], cosk_ref[:, rope_half:]
    s1k, s2k = sink_ref[:, :rope_half], sink_ref[:, rope_half:]
    k1, k2 = k_pe[:, :rope_half], k_pe[:, rope_half:]
    k1r = (k1 * c1k - k2 * s1k).astype(bf16)                         # [S, rh]
    k2r = (k2 * c2k + k1 * s2k).astype(bf16)
    v_lat_bf = v_lat.astype(bf16)

    # ---- q path, batched over this head group --------------------------------
    q_a = _rms_f32(dot(h, qa_w_ref[...]), qa_ln_ref[...]).astype(bf16)   # [S, q_lora]
    q_nope = dot(q_a, qb_nope_ref[0]).astype(bf16)                   # [S, G*nope]
    q_abs = dot(q_nope, kc_ref[0]).astype(bf16)                      # [S, G*kv_lora] (scale folded)
    qp = dot(q_a, qb_pe_ref[0])                                      # [S, G*rope]   (scale folded)
    gw = heads_per_group * rope_half
    # rotate_half for ALL heads of the group at once: split layout [P1|P2] ->
    # swapped [P2|P1], combined with cos=[c1|c2] and sign-folded sin=[-s1|s2].
    qp_sw = jnp.concatenate([qp[:, gw:], qp[:, :gw]], axis=-1)
    q_rot = (qp * cosq_ref[...] + qp_sw * sinq_ref[...]).astype(bf16)

    # ---- causal mask (diagonal always unmasked -> -1e30 additive mask is safe)
    qi = jax.lax.broadcasted_iota(jnp.int32, (s_len, s_len), 0)
    ki = jax.lax.broadcasted_iota(jnp.int32, (s_len, s_len), 1)
    causal = ki <= qi
    neg_inf = jnp.float32(-1e30)

    # ---- per-head MLA attention (statically unrolled over the small group) ----
    attn_heads = []
    for j in range(heads_per_group):
        q_abs_h = q_abs[:, j * kv_lora:(j + 1) * kv_lora]            # 128-lane aligned
        r1_h = q_rot[:, j * rope_half:(j + 1) * rope_half]
        r2_h = q_rot[:, gw + j * rope_half: gw + (j + 1) * rope_half]
        # scores: latent K=128 dot + two K=16 rope dots (no 160-wide concat)
        s = dot_nt(q_abs_h, v_lat_bf) + dot_nt(r1_h, k1r) + dot_nt(r2_h, k2r)
        s = jnp.where(causal, s, neg_inf)
        m = jnp.max(s, axis=-1, keepdims=True)
        p = jnp.exp(s - m)
        l = jnp.sum(p, axis=-1, keepdims=True)
        attn = dot(p.astype(bf16), v_lat_bf) * pl.reciprocal(l, approx=True)
        attn_heads.append(attn.astype(bf16))                         # [S, kv_lora]

    # ---- fused vc + o_proj: one K = G*kv_lora matmul into lane-dense slab ----
    attn_all = jnp.concatenate(attn_heads, axis=-1)                  # [S, G*kv_lora]
    out_ref[0] = dot(attn_all, vo_ref[0])                            # [S, hidden] f32


# -------------------- one-time weight / rope-table layout prep ----------------
def _block_diag(blocks):
    n = len(blocks)
    r, c = blocks[0].shape
    out = jnp.zeros((n * r, n * c), blocks[0].dtype)
    for i, b in enumerate(blocks):
        out = out.at[i * r:(i + 1) * r, i * c:(i + 1) * c].set(b)
    return out


def prepare_inputs(params, cos, sin):
    """One-time layout / precision prep (kept out of the per-call path)."""
    f32, bf16 = jnp.float32, jnp.bfloat16
    d = QK_ROPE_HEAD_DIM // 2
    g = HEADS_PER_GROUP
    scale = softmax_scale()

    qb = params["q_b_proj_w"].reshape(Q_LORA_RANK, NUM_HEADS, Q_HEAD_DIM)
    qb_nope = qb[:, :, :QK_NOPE_HEAD_DIM]
    qb_pe1 = qb[:, :, QK_NOPE_HEAD_DIM:QK_NOPE_HEAD_DIM + d]
    qb_pe2 = qb[:, :, QK_NOPE_HEAD_DIM + d:]

    ow = params["o_proj_w"]
    qb_nope_g, qb_pe_g, kc_g, vo_g = [], [], [], []
    for grp in range(NUM_HEAD_GROUPS):
        hs = slice(grp * g, (grp + 1) * g)
        qb_nope_g.append(qb_nope[:, hs].reshape(Q_LORA_RANK, g * QK_NOPE_HEAD_DIM))
        # split layout [pe1 of all group heads | pe2 of all group heads], scale folded
        qb_pe_g.append(scale * jnp.concatenate(
            [qb_pe1[:, hs].reshape(Q_LORA_RANK, g * d),
             qb_pe2[:, hs].reshape(Q_LORA_RANK, g * d)], axis=-1))
        # block-diagonal kc absorb (scale folded): [g*nope, g*kv_lora]
        kc_g.append(_block_diag([scale * params["kc_w"][h]
                                 for h in range(grp * g, (grp + 1) * g)]))
        # fused vc @ o_proj rows: [g*kv_lora, hidden]
        vo_g.append(jnp.concatenate(
            [params["vc_w"][h] @ ow[h * V_HEAD_DIM:(h + 1) * V_HEAD_DIM]
             for h in range(grp * g, (grp + 1) * g)], axis=0))

    kva = params["kv_a_proj_w"]
    c1, c2 = cos[:, :d], cos[:, d:]
    s1, s2 = sin[:, :d], sin[:, d:]
    cos_q = jnp.concatenate([jnp.tile(c1, (1, g)), jnp.tile(c2, (1, g))], axis=-1)
    sin_q = jnp.concatenate([jnp.tile(-s1, (1, g)), jnp.tile(s2, (1, g))], axis=-1)

    return dict(
        qa_w=params["q_a_proj_w"].astype(bf16),
        qa_ln=params["q_a_layernorm_w"].reshape(1, Q_LORA_RANK).astype(f32),
        kva_lat=kva[:, :KV_LORA_RANK].astype(bf16),
        kva_pe=kva[:, KV_LORA_RANK:].astype(bf16),
        kva_ln=params["kv_a_layernorm_w"].reshape(1, KV_LORA_RANK).astype(f32),
        qb_nope_g=jnp.stack(qb_nope_g).astype(bf16),     # [Ngrp, q_lora, g*nope]
        qb_pe_g=jnp.stack(qb_pe_g).astype(bf16),         # [Ngrp, q_lora, g*rope]
        kc_g=jnp.stack(kc_g).astype(bf16),               # [Ngrp, g*nope, g*kv_lora]
        vo_g=jnp.stack(vo_g).astype(bf16),               # [Ngrp, g*kv_lora, hidden]
        cos_q=cos_q.astype(f32), sin_q=sin_q.astype(f32),
        cos_k=cos.astype(f32), sin_k=sin.astype(f32),
    )


# -------------------------- wrapper: pallas_call -------------------------------
def deepseek_v2_attention(hidden_states, prepped):
    """hidden_states: [1, q_len, hidden] -> [1, q_len, hidden]."""
    q_len = hidden_states.shape[1]
    h = hidden_states[0].astype(jnp.float32)
    d = QK_ROPE_HEAD_DIM // 2

    def full_spec(x):
        nd = x.ndim
        return pl.BlockSpec(x.shape, lambda i, nd=nd: (0,) * nd)

    def group_spec(x):
        return pl.BlockSpec((1,) + x.shape[1:], lambda i: (i, 0, 0))

    inputs = (h, prepped["cos_q"], prepped["sin_q"], prepped["cos_k"], prepped["sin_k"],
              prepped["qa_w"], prepped["qa_ln"],
              prepped["kva_lat"], prepped["kva_pe"], prepped["kva_ln"],
              prepped["qb_nope_g"], prepped["qb_pe_g"], prepped["kc_g"], prepped["vo_g"])
    in_specs = ([full_spec(x) for x in inputs[:10]]
                + [group_spec(x) for x in inputs[10:]])

    kernel = functools.partial(_fused_mla_kernel,
                               heads_per_group=HEADS_PER_GROUP,
                               rope_half=d, kv_lora=KV_LORA_RANK)

    grp_out = pl.pallas_call(
        kernel,
        out_shape=jax.ShapeDtypeStruct((NUM_HEAD_GROUPS, q_len, HIDDEN), jnp.float32),
        grid=(NUM_HEAD_GROUPS,),
        in_specs=in_specs,
        out_specs=pl.BlockSpec((1, q_len, HIDDEN), lambda i: (i, 0, 0)),
        compiler_params=pltpu.CompilerParams(
            dimension_semantics=("parallel",),          # v7x: one head group per TC
            vmem_limit_bytes=32 * 1024 * 1024),
    )(*inputs)
    # tiny per-group partial o_proj slabs -> final hidden
    return jnp.sum(grp_out, axis=0)[None]               # [1, S, hidden]


# --------------------------- pure-JAX reference -------------------------------
def _rotate_half(x):
    dd = x.shape[-1] // 2
    return jnp.concatenate([-x[..., dd:], x[..., :dd]], axis=-1)


def apply_rotary_pos_emb(q_pe, k_pe, cos, sin):
    c = cos[:, None, :]
    s = sin[:, None, :]
    return (q_pe * c + _rotate_half(q_pe) * s,
            k_pe * c + _rotate_half(k_pe) * s)


def reference(hidden_states, cos, sin, params):
    h = hidden_states[0]

    def rms(x, w):
        var = jnp.mean(x * x, axis=-1, keepdims=True)
        return x * jax.lax.rsqrt(var + RMS_EPS) * w

    q_a = rms(h @ params["q_a_proj_w"], params["q_a_layernorm_w"])
    q = (q_a @ params["q_b_proj_w"]).reshape(Q_LEN, NUM_HEADS, Q_HEAD_DIM)
    q_nope, q_pe = q[..., :QK_NOPE_HEAD_DIM], q[..., QK_NOPE_HEAD_DIM:]
    q_nope_abs = jnp.einsum("shk,hkl->hsl", q_nope, params["kc_w"])
    kv = h @ params["kv_a_proj_w"]
    k_pe = kv[:, KV_LORA_RANK:]
    v_lat = rms(kv[:, :KV_LORA_RANK], params["kv_a_layernorm_w"])
    q_pe_r, k_pe_r = apply_rotary_pos_emb(q_pe, k_pe[:, None, :], cos, sin)
    query = jnp.concatenate([q_nope_abs, jnp.transpose(q_pe_r, (1, 0, 2))], -1)
    key = jnp.concatenate([v_lat, k_pe_r[:, 0, :]], -1)
    s = jnp.einsum("hsd,td->hst", query, key) * softmax_scale()
    mask = jnp.tril(jnp.ones((Q_LEN, Q_LEN), bool))
    s = jnp.where(mask[None], s, -1e30)
    p = jax.nn.softmax(s, axis=-1)
    attn = jnp.einsum("hst,td->hsd", p, v_lat)
    attn_v = jnp.einsum("hsl,hlv->hsv", attn, params["vc_w"])
    attn_v = jnp.transpose(attn_v, (1, 0, 2)).reshape(Q_LEN, -1)
    return (attn_v @ params["o_proj_w"])[None]


# ------------------------------ param init ------------------------------------
def make_params(key):
    ks = jax.random.split(key, 8)
    scale = 0.02
    # nn.Linear stores [out,in]; equivalent [in,out] weights are created
    # directly (synthetic, no bias since attention_bias=False).
    return {
        "q_a_proj_w":      scale * jax.random.normal(ks[0], (HIDDEN, Q_LORA_RANK), jnp.float32),
        "q_a_layernorm_w": jnp.ones((Q_LORA_RANK,), jnp.float32),
        "q_b_proj_w":      scale * jax.random.normal(ks[1], (Q_LORA_RANK, NUM_HEADS * Q_HEAD_DIM), jnp.float32),
        "kv_a_proj_w":     scale * jax.random.normal(ks[2], (HIDDEN, KV_LORA_RANK + QK_ROPE_HEAD_DIM), jnp.float32),
        "kv_a_layernorm_w": jnp.ones((KV_LORA_RANK,), jnp.float32),
        "kc_w":            scale * jax.random.normal(ks[3], (NUM_HEADS, QK_NOPE_HEAD_DIM, KV_LORA_RANK), jnp.float32),
        "vc_w":            scale * jax.random.normal(ks[4], (NUM_HEADS, KV_LORA_RANK, V_HEAD_DIM), jnp.float32),
        "o_proj_w":        scale * jax.random.normal(ks[5], (NUM_HEADS * V_HEAD_DIM, HIDDEN), jnp.float32),
    }


def make_rope(q_len, dim):
    half = dim // 2
    inv_freq = 1.0 / (10000.0 ** (jnp.arange(half, dtype=jnp.float32) / half))
    t = jnp.arange(q_len, dtype=jnp.float32)
    freqs = jnp.outer(t, inv_freq)                # [S, half]
    emb = jnp.concatenate([freqs, freqs], axis=-1)
    return jnp.cos(emb), jnp.sin(emb)             # [S, dim] each


if __name__ == "__main__":
    key = jax.random.PRNGKey(0)
    k_h, k_p = jax.random.split(key)
    hidden_states = jax.random.normal(k_h, (1, Q_LEN, HIDDEN), jnp.float32)
    cos, sin = make_rope(Q_LEN, QK_ROPE_HEAD_DIM)
    params = make_params(k_p)

    # one-time layout / bf16 / scale-folding prep (kept out of the per-call path)
    prepped = prepare_inputs(params, cos, sin)

    out = deepseek_v2_attention(hidden_states, prepped)
    out = jax.block_until_ready(out)

    ref = reference(hidden_states, cos, sin, params)
    # bf16 MXU operands vs f32 reference -> loosened tolerance (per review).
    np.testing.assert_allclose(np.asarray(out), np.asarray(ref),
                               rtol=2e-2, atol=2e-2)
    assert out.shape == (1, Q_LEN, HIDDEN)
    print("KERNEL_OK")
</pallas_src>

<mosaic_0001>
module attributes {stable_mosaic.version = 11 : i64} {
  func.func @_fused_mla_kernel(%arg0: i32, %arg1: memref<16x256xf32, #tpu.memory_space<vmem>>, %arg2: memref<16x64xf32, #tpu.memory_space<vmem>>, %arg3: memref<16x64xf32, #tpu.memory_space<vmem>>, %arg4: memref<16x32xf32, #tpu.memory_space<vmem>>, %arg5: memref<16x32xf32, #tpu.memory_space<vmem>>, %arg6: memref<256x64xbf16, #tpu.memory_space<vmem>>, %arg7: memref<1x64xf32, #tpu.memory_space<vmem>>, %arg8: memref<256x128xbf16, #tpu.memory_space<vmem>>, %arg9: memref<256x32xbf16, #tpu.memory_space<vmem>>, %arg10: memref<1x128xf32, #tpu.memory_space<vmem>>, %arg11: memref<1x64x128xbf16, #tpu.memory_space<vmem>>, %arg12: memref<1x64x64xbf16, #tpu.memory_space<vmem>>, %arg13: memref<1x128x256xbf16, #tpu.memory_space<vmem>>, %arg14: memref<1x256x256xbf16, #tpu.memory_space<vmem>>, %arg15: memref<1x16x256xf32, #tpu.memory_space<vmem>>) attributes {dimension_semantics = [#tpu.dimension_semantics<parallel>], iteration_bounds = array<i64: 2>, scalar_prefetch = 0 : i64, scratch_operands = 0 : i64, tpu.core_type = #tpu.core_type<tc>, window_params = [{pipeline_mode = #tpu.pipeline_mode<synchronous>, transform_indices = @transform_0, window_bounds = array<i64: 16, 256>}, {pipeline_mode = #tpu.pipeline_mode<synchronous>, transform_indices = @transform_1, window_bounds = array<i64: 16, 64>}, {pipeline_mode = #tpu.pipeline_mode<synchronous>, transform_indices = @transform_2, window_bounds = array<i64: 16, 64>}, {pipeline_mode = #tpu.pipeline_mode<synchronous>, transform_indices = @transform_3, window_bounds = array<i64: 16, 32>}, {pipeline_mode = #tpu.pipeline_mode<synchronous>, transform_indices = @transform_4, window_bounds = array<i64: 16, 32>}, {pipeline_mode = #tpu.pipeline_mode<synchronous>, transform_indices = @transform_5, window_bounds = array<i64: 256, 64>}, {pipeline_mode = #tpu.pipeline_mode<synchronous>, transform_indices = @transform_6, window_bounds = array<i64: 1, 64>}, {pipeline_mode = #tpu.pipeline_mode<synchronous>, transform_indices = @transform_7, window_bounds = array<i64: 256, 128>}, {pipeline_mode = #tpu.pipeline_mode<synchronous>, transform_indices = @transform_8, window_bounds = array<i64: 256, 32>}, {pipeline_mode = #tpu.pipeline_mode<synchronous>, transform_indices = @transform_9, window_bounds = array<i64: 1, 128>}, {transform_indices = @transform_10, window_bounds = array<i64: 1, 64, 128>}, {transform_indices = @transform_11, window_bounds = array<i64: 1, 64, 64>}, {transform_indices = @transform_12, window_bounds = array<i64: 1, 128, 256>}, {transform_indices = @transform_13, window_bounds = array<i64: 1, 256, 256>}, {transform_indices = @transform_14, window_bounds = array<i64: 1, 16, 256>}]} {
    %c0 = arith.constant 0 : index
    %c0_0 = arith.constant 0 : index
    %0 = vector.load %arg1[%c0, %c0_0] : memref<16x256xf32, #tpu.memory_space<vmem>>, vector<16x256xf32>
    %1 = arith.truncf %0 : vector<16x256xf32> to vector<16x256xbf16>
    %c0_1 = arith.constant 0 : index
    %c0_2 = arith.constant 0 : index
    %2 = vector.load %arg8[%c0_1, %c0_2] : memref<256x128xbf16, #tpu.memory_space<vmem>>, vector<256x128xbf16>
    %cst = arith.constant dense<0.000000e+00> : vector<16x128xf32>
    %3 = tpu.matmul %1, %2, %cst {dimension_numbers = #tpu.dot_dimension_numbers<[1], [0], [0], [1], [0, 0, 1, 1], [], []>} : vector<16x256xbf16>, vector<256x128xbf16>, vector<16x128xf32> -> vector<16x128xf32>
    %c0_3 = arith.constant 0 : index
    %c0_4 = arith.constant 0 : index
    %4 = vector.load %arg10[%c0_3, %c0_4] : memref<1x128xf32, #tpu.memory_space<vmem>>, vector<1x128xf32>
    %5 = arith.mulf %3, %3 : vector<16x128xf32>
    %cst_5 = arith.constant dense<0.000000e+00> : vector<16xf32>
    %6 = vector.multi_reduction <add>, %5, %cst_5 [1] : vector<16x128xf32> to vector<16xf32>
    %7 = vector.shape_cast %6 : vector<16xf32> to vector<16x1xf32>
    %cst_6 = arith.constant 1.280000e+02 : f32
    %8 = vector.broadcast %cst_6 : f32 to vector<16x1xf32>
    %9 = arith.divf %7, %8 : vector<16x1xf32>
    %cst_7 = arith.constant 9.99999997E-7 : f32
    %10 = vector.broadcast %cst_7 : f32 to vector<16x1xf32>
    %11 = arith.addf %9, %10 : vector<16x1xf32>
    %12 = math.rsqrt %11 : vector<16x1xf32>
    %13 = vector.broadcast %12 : vector<16x1xf32> to vector<16x128xf32>
    %14 = arith.mulf %3, %13 : vector<16x128xf32>
    %15 = vector.broadcast %4 : vector<1x128xf32> to vector<16x128xf32>
    %16 = arith.mulf %14, %15 : vector<16x128xf32>
    %c0_8 = arith.constant 0 : index
    %c0_9 = arith.constant 0 : index
    %17 = vector.load %arg9[%c0_8, %c0_9] : memref<256x32xbf16, #tpu.memory_space<vmem>>, vector<256x32xbf16>
    %cst_10 = arith.constant dense<0.000000e+00> : vector<16x32xf32>
    %18 = tpu.matmul %1, %17, %cst_10 {dimension_numbers = #tpu.dot_dimension_numbers<[1], [0], [0], [1], [0, 0, 1, 1], [], []>} : vector<16x256xbf16>, vector<256x32xbf16>, vector<16x32xf32> -> vector<16x32xf32>
    %c0_11 = arith.constant 0 : index
    %c0_12 = arith.constant 0 : index
    %19 = vector.load %arg4[%c0_11, %c0_12] : memref<16x32xf32, #tpu.memory_space<vmem>>, vector<16x16xf32>
    %c0_13 = arith.constant 0 : index
    %c16 = arith.constant 16 : index
    %20 = vector.load %arg4[%c0_13, %c16] : memref<16x32xf32, #tpu.memory_space<vmem>>, vector<16x16xf32>
    %c0_14 = arith.constant 0 : index
    %c0_15 = arith.constant 0 : index
    %21 = vector.load %arg5[%c0_14, %c0_15] : memref<16x32xf32, #tpu.memory_space<vmem>>, vector<16x16xf32>
    %c0_16 = arith.constant 0 : index
    %c16_17 = arith.constant 16 : index
    %22 = vector.load %arg5[%c0_16, %c16_17] : memref<16x32xf32, #tpu.memory_space<vmem>>, vector<16x16xf32>
    %23 = vector.extract_strided_slice %18 {offsets = [0, 0], sizes = [16, 16], strides = [1, 1]} : vector<16x32xf32> to vector<16x16xf32>
    %24 = vector.extract_strided_slice %18 {offsets = [0, 16], sizes = [16, 16], strides = [1, 1]} : vector<16x32xf32> to vector<16x16xf32>
    %25 = arith.mulf %23, %19 : vector<16x16xf32>
    %26 = arith.mulf %24, %21 : vector<16x16xf32>
    %27 = arith.subf %25, %26 : vector<16x16xf32>
    %28 = arith.truncf %27 : vector<16x16xf32> to vector<16x16xbf16>
    %29 = arith.mulf %24, %20 : vector<16x16xf32>
    %30 = arith.mulf %23, %22 : vector<16x16xf32>
    %31 = arith.addf %29, %30 : vector<16x16xf32>
    %32 = arith.truncf %31 : vector<16x16xf32> to vector<16x16xbf16>
    %33 = arith.truncf %16 : vector<16x128xf32> to vector<16x128xbf16>
    %c0_18 = arith.constant 0 : index
    %c0_19 = arith.constant 0 : index
    %34 = vector.load %arg6[%c0_18, %c0_19] : memref<256x64xbf16, #tpu.memory_space<vmem>>, vector<256x64xbf16>
    %cst_20 = arith.constant dense<0.000000e+00> : vector<16x64xf32>
    %35 = tpu.matmul %1, %34, %cst_20 {dimension_numbers = #tpu.dot_dimension_numbers<[1], [0], [0], [1], [0, 0, 1, 1], [], []>} : vector<16x256xbf16>, vector<256x64xbf16>, vector<16x64xf32> -> vector<16x64xf32>
    %c0_21 = arith.constant 0 : index
    %c0_22 = arith.constant 0 : index
    %36 = vector.load %arg7[%c0_21, %c0_22] : memref<1x64xf32, #tpu.memory_space<vmem>>, vector<1x64xf32>
    %37 = arith.mulf %35, %35 : vector<16x64xf32>
    %cst_23 = arith.constant dense<0.000000e+00> : vector<16xf32>
    %38 = vector.multi_reduction <add>, %37, %cst_23 [1] : vector<16x64xf32> to vector<16xf32>
    %39 = vector.shape_cast %38 : vector<16xf32> to vector<16x1xf32>
    %cst_24 = arith.constant 6.400000e+01 : f32
    %40 = vector.broadcast %cst_24 : f32 to vector<16x1xf32>
    %41 = arith.divf %39, %40 : vector<16x1xf32>
    %cst_25 = arith.constant 9.99999997E-7 : f32
    %42 = vector.broadcast %cst_25 : f32 to vector<16x1xf32>
    %43 = arith.addf %41, %42 : vector<16x1xf32>
    %44 = math.rsqrt %43 : vector<16x1xf32>
    %45 = vector.broadcast %44 : vector<16x1xf32> to vector<16x64xf32>
    %46 = arith.mulf %35, %45 : vector<16x64xf32>
    %47 = vector.broadcast %36 : vector<1x64xf32> to vector<16x64xf32>
    %48 = arith.mulf %46, %47 : vector<16x64xf32>
    %49 = arith.truncf %48 : vector<16x64xf32> to vector<16x64xbf16>
    %c0_26 = arith.constant 0 : index
    %c0_27 = arith.constant 0 : index
    %c0_28 = arith.constant 0 : index
    %50 = vector.load %arg11[%c0_26, %c0_27, %c0_28] : memref<1x64x128xbf16, #tpu.memory_space<vmem>>, vector<1x64x128xbf16>
    %51 = vector.shape_cast %50 : vector<1x64x128xbf16> to vector<64x128xbf16>
    %cst_29 = arith.constant dense<0.000000e+00> : vector<16x128xf32>
    %52 = tpu.matmul %49, %51, %cst_29 {dimension_numbers = #tpu.dot_dimension_numbers<[1], [0], [0], [1], [0, 0, 1, 1], [], []>} : vector<16x64xbf16>, vector<64x128xbf16>, vector<16x128xf32> -> vector<16x128xf32>
    %53 = arith.truncf %52 : vector<16x128xf32> to vector<16x128xbf16>
    %c0_30 = arith.constant 0 : index
    %c0_31 = arith.constant 0 : index
    %c0_32 = arith.constant 0 : index
    %54 = vector.load %arg13[%c0_30, %c0_31, %c0_32] : memref<1x128x256xbf16, #tpu.memory_space<vmem>>, vector<1x128x256xbf16>
    %55 = vector.shape_cast %54 : vector<1x128x256xbf16> to vector<128x256xbf16>
    %cst_33 = arith.constant dense<0.000000e+00> : vector<16x256xf32>
    %56 = tpu.matmul %53, %55, %cst_33 {dimension_numbers = #tpu.dot_dimension_numbers<[1], [0], [0], [1], [0, 0, 1, 1], [], []>} : vector<16x128xbf16>, vector<128x256xbf16>, vector<16x256xf32> -> vector<16x256xf32>
    %57 = arith.truncf %56 : vector<16x256xf32> to vector<16x256xbf16>
    %c0_34 = arith.constant 0 : index
    %c0_35 = arith.constant 0 : index
    %c0_36 = arith.constant 0 : index
    %58 = vector.load %arg12[%c0_34, %c0_35, %c0_36] : memref<1x64x64xbf16, #tpu.memory_space<vmem>>, vector<1x64x64xbf16>
    %59 = vector.shape_cast %58 : vector<1x64x64xbf16> to vector<64x64xbf16>
    %cst_37 = arith.constant dense<0.000000e+00> : vector<16x64xf32>
    %60 = tpu.matmul %49, %59, %cst_37 {dimension_numbers = #tpu.dot_dimension_numbers<[1], [0], [0], [1], [0, 0, 1, 1], [], []>} : vector<16x64xbf16>, vector<64x64xbf16>, vector<16x64xf32> -> vector<16x64xf32>
    %61 = vector.extract_strided_slice %60 {offsets = [0, 32], sizes = [16, 32], strides = [1, 1]} : vector<16x64xf32> to vector<16x32xf32>
    %62 = vector.extract_strided_slice %60 {offsets = [0, 0], sizes = [16, 32], strides = [1, 1]} : vector<16x64xf32> to vector<16x32xf32>
    %63 = tpu.concatenate %61, %62 in 1 : vector<16x32xf32>, vector<16x32xf32> -> vector<16x64xf32>
    %c0_38 = arith.constant 0 : index
    %c0_39 = arith.constant 0 : index
    %64 = vector.load %arg2[%c0_38, %c0_39] : memref<16x64xf32, #tpu.memory_space<vmem>>, vector<16x64xf32>
    %65 = arith.mulf %60, %64 : vector<16x64xf32>
    %c0_40 = arith.constant 0 : index
    %c0_41 = arith.constant 0 : index
    %66 = vector.load %arg3[%c0_40, %c0_41] : memref<16x64xf32, #tpu.memory_space<vmem>>, vector<16x64xf32>
    %67 = arith.mulf %63, %66 : vector<16x64xf32>
    %68 = arith.addf %65, %67 : vector<16x64xf32>
    %69 = arith.truncf %68 : vector<16x64xf32> to vector<16x64xbf16>
    %70 = tpu.iota {dimensions = array<i32: 0>} : vector<16x16xi32>
    %71 = tpu.iota {dimensions = array<i32: 1>} : vector<16x16xi32>
    %72 = arith.cmpi sle, %71, %70 : vector<16x16xi32>
    %73 = vector.extract_strided_slice %57 {offsets = [0, 0], sizes = [16, 128], strides = [1, 1]} : vector<16x256xbf16> to vector<16x128xbf16>
    %74 = vector.extract_strided_slice %69 {offsets = [0, 0], sizes = [16, 16], strides = [1, 1]} : vector<16x64xbf16> to vector<16x16xbf16>
    %75 = vector.extract_strided_slice %69 {offsets = [0, 32], sizes = [16, 16], strides = [1, 1]} : vector<16x64xbf16> to vector<16x16xbf16>
    %cst_42 = arith.constant dense<0.000000e+00> : vector<16x16xf32>
    %76 = tpu.matmul %73, %33, %cst_42 {dimension_numbers = #tpu.dot_dimension_numbers<[1], [1], [0], [0], [0, 0, 1, 0], [], []>} : vector<16x128xbf16>, vector<16x128xbf16>, vector<16x16xf32> -> vector<16x16xf32>
    %cst_43 = arith.constant dense<0.000000e+00> : vector<16x16xf32>
    %77 = tpu.matmul %74, %28, %cst_43 {dimension_numbers = #tpu.dot_dimension_numbers<[1], [1], [0], [0], [0, 0, 1, 0], [], []>} : vector<16x16xbf16>, vector<16x16xbf16>, vector<16x16xf32> -> vector<16x16xf32>
    %78 = arith.addf %76, %77 : vector<16x16xf32>
    %cst_44 = arith.constant dense<0.000000e+00> : vector<16x16xf32>
    %79 = tpu.matmul %75, %32, %cst_44 {dimension_numbers = #tpu.dot_dimension_numbers<[1], [1], [0], [0], [0, 0, 1, 0], [], []>} : vector<16x16xbf16>, vector<16x16xbf16>, vector<16x16xf32> -> vector<16x16xf32>
    %80 = arith.addf %78, %79 : vector<16x16xf32>
    %cst_45 = arith.constant -1.000000e+30 : f32
    %81 = vector.broadcast %cst_45 : f32 to vector<16x16xf32>
    %82 = arith.select %72, %80, %81 : vector<16x16xi1>, vector<16x16xf32>
    %cst_46 = arith.constant dense<0xFF800000> : vector<16xf32>
    %83 = vector.multi_reduction <maximumf>, %82, %cst_46 [1] : vector<16x16xf32> to vector<16xf32>
    %84 = vector.shape_cast %83 : vector<16xf32> to vector<16x1xf32>
    %85 = vector.broadcast %84 : vector<16x1xf32> to vector<16x16xf32>
    %86 = arith.subf %82, %85 : vector<16x16xf32>
    %87 = math.exp %86 : vector<16x16xf32>
    %cst_47 = arith.constant dense<0.000000e+00> : vector<16xf32>
    %88 = vector.multi_reduction <add>, %87, %cst_47 [1] : vector<16x16xf32> to vector<16xf32>
    %89 = vector.shape_cast %88 : vector<16xf32> to vector<16x1xf32>
    %90 = arith.truncf %87 : vector<16x16xf32> to vector<16x16xbf16>
    %cst_48 = arith.constant dense<0.000000e+00> : vector<16x128xf32>
    %91 = tpu.matmul %90, %33, %cst_48 {dimension_numbers = #tpu.dot_dimension_numbers<[1], [0], [0], [1], [0, 0, 1, 1], [], []>} : vector<16x16xbf16>, vector<16x128xbf16>, vector<16x128xf32> -> vector<16x128xf32>
    %92 = tpu.reciprocal %89 {approx = true} : vector<16x1xf32> -> vector<16x1xf32>
    %93 = vector.broadcast %92 : vector<16x1xf32> to vector<16x128xf32>
    %94 = arith.mulf %91, %93 : vector<16x128xf32>
    %95 = arith.truncf %94 : vector<16x128xf32> to vector<16x128xbf16>
    %96 = vector.extract_strided_slice %57 {offsets = [0, 128], sizes = [16, 128], strides = [1, 1]} : vector<16x256xbf16> to vector<16x128xbf16>
    %97 = vector.extract_strided_slice %69 {offsets = [0, 16], sizes = [16, 16], strides = [1, 1]} : vector<16x64xbf16> to vector<16x16xbf16>
    %98 = vector.extract_strided_slice %69 {offsets = [0, 48], sizes = [16, 16], strides = [1, 1]} : vector<16x64xbf16> to vector<16x16xbf16>
    %cst_49 = arith.constant dense<0.000000e+00> : vector<16x16xf32>
    %99 = tpu.matmul %96, %33, %cst_49 {dimension_numbers = #tpu.dot_dimension_numbers<[1], [1], [0], [0], [0, 0, 1, 0], [], []>} : vector<16x128xbf16>, vector<16x128xbf16>, vector<16x16xf32> -> vector<16x16xf32>
    %cst_50 = arith.constant dense<0.000000e+00> : vector<16x16xf32>
    %100 = tpu.matmul %97, %28, %cst_50 {dimension_numbers = #tpu.dot_dimension_numbers<[1], [1], [0], [0], [0, 0, 1, 0], [], []>} : vector<16x16xbf16>, vector<16x16xbf16>, vector<16x16xf32> -> vector<16x16xf32>
    %101 = arith.addf %99, %100 : vector<16x16xf32>
    %cst_51 = arith.constant dense<0.000000e+00> : vector<16x16xf32>
    %102 = tpu.matmul %98, %32, %cst_51 {dimension_numbers = #tpu.dot_dimension_numbers<[1], [1], [0], [0], [0, 0, 1, 0], [], []>} : vector<16x16xbf16>, vector<16x16xbf16>, vector<16x16xf32> -> vector<16x16xf32>
    %103 = arith.addf %101, %102 : vector<16x16xf32>
    %cst_52 = arith.constant -1.000000e+30 : f32
    %104 = vector.broadcast %cst_52 : f32 to vector<16x16xf32>
    %105 = arith.select %72, %103, %104 : vector<16x16xi1>, vector<16x16xf32>
    %cst_53 = arith.constant dense<0xFF800000> : vector<16xf32>
    %106 = vector.multi_reduction <maximumf>, %105, %cst_53 [1] : vector<16x16xf32> to vector<16xf32>
    %107 = vector.shape_cast %106 : vector<16xf32> to vector<16x1xf32>
    %108 = vector.broadcast %107 : vector<16x1xf32> to vector<16x16xf32>
    %109 = arith.subf %105, %108 : vector<16x16xf32>
    %110 = math.exp %109 : vector<16x16xf32>
    %cst_54 = arith.constant dense<0.000000e+00> : vector<16xf32>
    %111 = vector.multi_reduction <add>, %110, %cst_54 [1] : vector<16x16xf32> to vector<16xf32>
    %112 = vector.shape_cast %111 : vector<16xf32> to vector<16x1xf32>
    %113 = arith.truncf %110 : vector<16x16xf32> to vector<16x16xbf16>
    %cst_55 = arith.constant dense<0.000000e+00> : vector<16x128xf32>
    %114 = tpu.matmul %113, %33, %cst_55 {dimension_numbers = #tpu.dot_dimension_numbers<[1], [0], [0], [1], [0, 0, 1, 1], [], []>} : vector<16x16xbf16>, vector<16x128xbf16>, vector<16x128xf32> -> vector<16x128xf32>
    %115 = tpu.reciprocal %112 {approx = true} : vector<16x1xf32> -> vector<16x1xf32>
    %116 = vector.broadcast %115 : vector<16x1xf32> to vector<16x128xf32>
    %117 = arith.mulf %114, %116 : vector<16x128xf32>
    %118 = arith.truncf %117 : vector<16x128xf32> to vector<16x128xbf16>
    %119 = tpu.concatenate %95, %118 in 1 : vector<16x128xbf16>, vector<16x128xbf16> -> vector<16x256xbf16>
    %c0_56 = arith.constant 0 : index
    %c0_57 = arith.constant 0 : index
    %c0_58 = arith.constant 0 : index
    %120 = vector.load %arg14[%c0_56, %c0_57, %c0_58] : memref<1x256x256xbf16, #tpu.memory_space<vmem>>, vector<1x256x256xbf16>
    %121 = vector.shape_cast %120 : vector<1x256x256xbf16> to vector<256x256xbf16>
    %cst_59 = arith.constant dense<0.000000e+00> : vector<16x256xf32>
    %122 = tpu.matmul %119, %121, %cst_59 {dimension_numbers = #tpu.dot_dimension_numbers<[1], [0], [0], [1], [0, 0, 1, 1], [], []>} : vector<16x256xbf16>, vector<256x256xbf16>, vector<16x256xf32> -> vector<16x256xf32>
    %c0_60 = arith.constant 0 : index
    %c0_61 = arith.constant 0 : index
    %c0_62 = arith.constant 0 : index
    %123 = vector.load %arg15[%c0_60, %c0_61, %c0_62] : memref<1x16x256xf32, #tpu.memory_space<vmem>>, vector<1x16x256xf32>
    %124 = vector.shape_cast %123 : vector<1x16x256xf32> to vector<16x256xf32>
    %125 = vector.shape_cast %122 : vector<16x256xf32> to vector<1x16x256xf32>
    tpu.vector_store %arg15[%c0_60, %c0_61, %c0_62], %125 {strides = array<i32>} : memref<1x16x256xf32, #tpu.memory_space<vmem>>, vector<1x16x256xf32>,
    return
  }
  func.func @transform_0(%arg0: i32) -> (i32, i32) {
    %c0_i32 = arith.constant 0 : i32
    %c0_i32_0 = arith.constant 0 : i32
    %c0_i32_1 = arith.constant 0 : i32
    return %c0_i32, %c0_i32_0 : i32, i32
  }
  func.func @transform_1(%arg0: i32) -> (i32, i32) {
    %c0_i32 = arith.constant 0 : i32
    %c0_i32_0 = arith.constant 0 : i32
    %c0_i32_1 = arith.constant 0 : i32
    return %c0_i32, %c0_i32_0 : i32, i32
  }
  func.func @transform_2(%arg0: i32) -> (i32, i32) {
    %c0_i32 = arith.constant 0 : i32
    %c0_i32_0 = arith.constant 0 : i32
    %c0_i32_1 = arith.constant 0 : i32
    return %c0_i32, %c0_i32_0 : i32, i32
  }
  func.func @transform_3(%arg0: i32) -> (i32, i32) {
    %c0_i32 = arith.constant 0 : i32
    %c0_i32_0 = arith.constant 0 : i32
    %c0_i32_1 = arith.constant 0 : i32
    return %c0_i32, %c0_i32_0 : i32, i32
  }
  func.func @transform_4(%arg0: i32) -> (i32, i32) {
    %c0_i32 = arith.constant 0 : i32
    %c0_i32_0 = arith.constant 0 : i32
    %c0_i32_1 = arith.constant 0 : i32
    return %c0_i32, %c0_i32_0 : i32, i32
  }
  func.func @transform_5(%arg0: i32) -> (i32, i32) {
    %c0_i32 = arith.constant 0 : i32
    %c0_i32_0 = arith.constant 0 : i32
    %c0_i32_1 = arith.constant 0 : i32
    return %c0_i32, %c0_i32_0 : i32, i32
  }
  func.func @transform_6(%arg0: i32) -> (i32, i32) {
    %c0_i32 = arith.constant 0 : i32
    %c0_i32_0 = arith.constant 0 : i32
    %c0_i32_1 = arith.constant 0 : i32
    return %c0_i32, %c0_i32_0 : i32, i32
  }
  func.func @transform_7(%arg0: i32) -> (i32, i32) {
    %c0_i32 = arith.constant 0 : i32
    %c0_i32_0 = arith.constant 0 : i32
    %c0_i32_1 = arith.constant 0 : i32
    return %c0_i32, %c0_i32_0 : i32, i32
  }
  func.func @transform_8(%arg0: i32) -> (i32, i32) {
    %c0_i32 = arith.constant 0 : i32
    %c0_i32_0 = arith.constant 0 : i32
    %c0_i32_1 = arith.constant 0 : i32
    return %c0_i32, %c0_i32_0 : i32, i32
  }
  func.func @transform_9(%arg0: i32) -> (i32, i32) {
    %c0_i32 = arith.constant 0 : i32
    %c0_i32_0 = arith.constant 0 : i32
    %c0_i32_1 = arith.constant 0 : i32
    return %c0_i32, %c0_i32_0 : i32, i32
  }
  func.func @transform_10(%arg0: i32) -> (i32, i32, i32) {
    %c0_i32 = arith.constant 0 : i32
    %c0_i32_0 = arith.constant 0 : i32
    %c0_i32_1 = arith.constant 0 : i32
    return %arg0, %c0_i32, %c0_i32_0 : i32, i32, i32
  }
  func.func @transform_11(%arg0: i32) -> (i32, i32, i32) {
    %c0_i32 = arith.constant 0 : i32
    %c0_i32_0 = arith.constant 0 : i32
    %c0_i32_1 = arith.constant 0 : i32
    return %arg0, %c0_i32, %c0_i32_0 : i32, i32, i32
  }
  func.func @transform_12(%arg0: i32) -> (i32, i32, i32) {
    %c0_i32 = arith.constant 0 : i32
    %c0_i32_0 = arith.constant 0 : i32
    %c0_i32_1 = arith.constant 0 : i32
    return %arg0, %c0_i32, %c0_i32_0 : i32, i32, i32
  }
  func.func @transform_13(%arg0: i32) -> (i32, i32, i32) {
    %c0_i32 = arith.constant 0 : i32
    %c0_i32_0 = arith.constant 0 : i32
    %c0_i32_1 = arith.constant 0 : i32
    return %arg0, %c0_i32, %c0_i32_0 : i32, i32, i32
  }
  func.func @transform_14(%arg0: i32) -> (i32, i32, i32) {
    %c0_i32 = arith.constant 0 : i32
    %c0_i32_0 = arith.constant 0 : i32
    %c0_i32_1 = arith.constant 0 : i32
    return %arg0, %c0_i32, %c0_i32_0 : i32, i32, i32
  }
}

</mosaic_0001>

<bundles_post_ra>
// kernel: tpu_custom_call.1
= control target key start
LH: loop header
LB: loop body
LE: loop exit
PB: predicated region body
PF: predicated region fallthrough
CT: control target
= control target key end

     0   :  { %s3873_s0 = inlined_call_operand.hbm [shape: f32[16,256], index: 0, kind: input, shape index: {}]   ;;  %s3874_s1 = inlined_call_operand.hbm [shape: f32[16,64], index: 1, kind: input, shape index: {}]   ;;  %s3875_s2 = inlined_call_operand.hbm [shape: f32[16,64], index: 2, kind: input, shape index: {}]   ;;  %s3876_s3 = inlined_call_operand.hbm [shape: f32[16,32], index: 3, kind: input, shape index: {}]   ;;  %s3877_s4 = inlined_call_operand.hbm [shape: f32[16,32], index: 4, kind: input, shape index: {}]   ;;  %s3878_s5 = inlined_call_operand.vmem [shape: bf16[256,64], index: 5, kind: input, shape index: {}]   ;;  %s3879_s6 = inlined_call_operand.vmem [shape: f32[1,64], index: 6, kind: input, shape index: {}]   ;;  %s3880_s7 = inlined_call_operand.hbm [shape: bf16[256,128], index: 7, kind: input, shape index: {}]   ;;  %s3881_s8 = inlined_call_operand.vmem [shape: bf16[256,32], index: 8, kind: input, shape index: {}]   ;;  %s3882_s9 = inlined_call_operand.vmem [shape: f32[1,128], index: 9, kind: input, shape index: {}]   ;;  %s3883_s10 = inlined_call_operand.vmem [shape: bf16[2,64,128], index: 10, kind: input, shape index: {}]   ;;  %s3884_s11 = inlined_call_operand.hbm [shape: bf16[2,64,64], index: 11, kind: input, shape index: {}]   ;;  %s3885_s12 = inlined_call_operand.vmem [shape: bf16[2,128,256], index: 12, kind: input, shape index: {}]   ;;  %s3886_s13 = inlined_call_operand.hbm [shape: bf16[2,256,256], index: 13, kind: input, shape index: {}]   ;;  %s3887_s14 = inlined_call_operand.hbm [shape: f32[2,16,256], index: 14, kind: output, shape index: {}]  }
   0x1   :  { %3901 = sst [smem:[#allocation27_spill]] %s3873_s0 }
   0x2   :  { %3902 = sst [smem:[#allocation28_spill]] %s3874_s1 }
   0x3   :  { %3903 = sst [smem:[#allocation29_spill]] %s3875_s2 }
   0x4   :  { %3904 = sst [smem:[#allocation30_spill]] %s3876_s3 }
   0x5   :  { %3905 = sst [smem:[#allocation31_spill]] %s3877_s4 }
   0x6   :  { %3906 = sst [smem:[#allocation32_spill]] %s3879_s6 }
   0x7   :  { %3907 = sst [smem:[#allocation33_spill]] %s3880_s7 }
   0x8   :  { %3908 = sst [smem:[#allocation34_spill]] %s3882_s9 }
   0x9   :  { %3909 = sst [smem:[#allocation35_spill]] %s3883_s10 }
   0xa   :  { %3910 = sst [smem:[#allocation36_spill]] %s3884_s11 }
   0xb   :  { %3911 = sst [smem:[#allocation37_spill]] %s3885_s12 }
   0xc   :  { %3912 = sst [smem:[#allocation38_spill]] %s3887_s14 }
   0xd   :  { %19 = vsyncpa [#allocation3], 0 }
   0xe   :  { %20 = vsyncpa [#allocation6], 0 }
   0xf   :  { %21 = vsyncpa [#allocation9], 0 }
  0x10   :  { %22 = vsyncpa [#allocation12], 0 }
  0x11   :  { %23 = vsyncpa [#allocation4], 0 }
  0x12   :  { %25 = vsyncpa [#allocation4 + $0x1], 0  ;;  %s3353_s29 = smov 0   ;;  %s3355_s30 = smov 0  }
  0x13   :  { %s3357_s15 = smov 0   ;;  %s3359_s16 = smov 0  }
  0x14 LB: > { %3913 = sst [smem:[#allocation22_spill]] %s3244_s29  ;;  %s3377_s20 = sadd.s32 4294967295, %s3256_s16   ;;  %s3256_s16 = sphi %s3359_s16, %s3952_s16   ;;  %s3252_s15 = sphi %s3357_s15, %s3956_s15   ;;  %s3248_s30 = sphi %s3355_s30, %s3955_s30   ;;  %s3244_s29 = sphi %s3353_s29, %s3954_s29  }
  0x15   : > { %s3914_s0 = sld [smem:[#allocation27_spill]]  ;;  %p2212_p0 = scmp.ge.s32.totalorder %s3256_s16, 1 }
  0x16   : > { %p3900_p1 = scmp.eq.s32.totalorder %s3377_s20, 0  ;;  %p376_p2 = scmp.lt.s32.totalorder %s3256_s16, 3 }
  0x17   : > { %s3258_s22 = smov [#allocation2]   ;;  %s3916_s1 = sld [smem:[#allocation28_spill]] }
  0x18   : > { %p3382_p3 = pnand %p2212_p0, %p376_p2  ;;  %s389_s23 = sshll.u32 %s3258_s22, 4  ;;  %s390_s23 = int_to_ptr.vmem [resolvable:$true] %s389_s23 }
  0x19   : > { %s3259_s28 = smov [#allocation5]   ;;  %s3260_s18 = smov 256  }
  0x1a   : > { %p2808_p4 = pneg %p3382_p3  ;;  %s403_s17 = sshll.u32 %s3259_s28, 4  ;;  %s404_s17 = int_to_ptr.vmem [resolvable:$true] %s403_s17 }
  0x1b   : > { %s387_s19 = sshll.u32 %s3914_s0, 4  ;;  %s3261_s22 = smov 16   ;;  %s388_s19 = int_to_ptr.hbm [resolvable:$true] %s387_s19 }
  0x1c   : > { %p3394_p6 = pnand %p2808_p4, %p3900_p1  ;;  %s3888_s24 = smov 128  }
  0x1d   : > { %s401_s26 = sshll.u32 %s3916_s1, 4  ;;  %s3890_s25 = smov 8   ;;  %s402_s26 = int_to_ptr.hbm [resolvable:$true] %s401_s26 }
  0x1e   : > { %2811 = dma.hbm_to_vmem [thread:$0]  (!%p3394_p6), %s388_s19, 512, %s390_s23, [#allocation3], %s3260_s18, %s3260_s18, %s3261_s22  }
  0x1f   : > { %2814 = dma.hbm_to_vmem [thread:$0]  (!%p3394_p6), %s402_s26, 256, %s404_s17, [#allocation6], %s3888_s24, %s3888_s24, %s3890_s25  }
  0x20   : > { %s3918_s3 = sld [smem:[#allocation30_spill]]  ;;  %s3264_s19 = smov [#allocation8]  }
  0x21   : > { %s431_s23 = sshll.u32 %s3264_s19, 4  ;;  %s2211_s18 = sadd.s32 4294967294, %s3256_s16   ;;  %s432_s23 = int_to_ptr.vmem [resolvable:$true] %s431_s23 }
  0x22   : > { %s3415_s22 = sadd.s32 1, %s3256_s16   ;;  %s274_s0 = sadd.s32 1, %s3252_s15 }
  0x23   : > { %3919 = sst [smem:[#allocation23_spill]] %s3415_s22  ;;  %s271_s26 = ssub.s32 %s3256_s16, %s3415_s22 }
  0x24   : > { %p281_p7 = scmp.ne.s32.totalorder %s3252_s15, %s3248_s30  ;;  %p272_p8 = scmp.eq.s32.totalorder %s271_s26, 0 }
  0x25   : > { %p282_p9 = scmp.eq.s32.totalorder %s3256_s16, 0  ;;  %p287_p10 = scmp.ne.s32.totalorder %s3248_s30, %s3244_s29 }
  0x26   : > { %s429_s1 = sshll.u32 %s3918_s3, 4  ;;  %p363_p11 = scmp.eq.s32.totalorder %s3377_s20, 1  ;;  %s430_s1 = int_to_ptr.hbm [resolvable:$true] %s429_s1 }
  0x27   : > { %2820 = dma.hbm_to_vmem [thread:$0]  (!%p3394_p6), %s430_s1, 256, %s432_s23, [#allocation9], %s3888_s24, %s3888_s24, %s3890_s25  }
  0x28   : > { %s3427_s17 = scalar_select %p272_p8, %s3252_s15, %s274_s0  }
  0x29   : > { %p3429_p12 = por %p282_p9, %p281_p7  ;;  %p3435_p13 = por %p3900_p1, %p287_p10 }
  0x2a   : > { %3920 = sst [smem:[#allocation24_spill]] %s3427_s17  ;;  %p3439_p0 = por %p363_p11, %p281_p7 }
  0x2b   : > { %p369_p2 = scmp.eq.s32.totalorder %s2211_s18, 1  ;;  %p2844_p8 = scmp.lt.s32.totalorder %s3256_s16, 2 }
  0x2c   : > { %s3923_s19 = scalar_select %p3439_p0, 1, 0 }
  0x2d   : > { %p3443_p4 = por %p369_p2, %p287_p10  ;;  %s493_s0 = sand.u32 1, %s3256_s16  }
  0x2e   : > { %3924 = sst [smem:[#allocation25_spill]] %s3923_s19  ;;  %s3899_s26 = sand.u32 1, %s3252_s15  }
  0x2f   : > { %s3925_s23 = scalar_select %p3443_p4, 1, 0 }
  0x30   : > { %s2220_s24 = sshll.u32 %s3899_s26, 5  ;;  %s2669_s25 = sshll.u32 %s3256_s16, 5 }
  0x31   : > { %3926 = sst [smem:[#allocation26_spill]] %s3925_s23  ;;  %s497_s29 = scalar_lea.vmem [#allocation13], %s2220_s24 }
  0x32   : > { %s3927_s11 = sld [smem:[#allocation36_spill]]  ;;  %s505_s14 = sshll.u32 %s497_s29, 4  ;;  %s506_s14 = int_to_ptr.vmem [resolvable:$true] %s505_s14 }
  0x33   : > { %p3458_p7 = pnand %p2844_p8, %p3429_p12  ;;  %s3929_s2 = sld [smem:[#allocation29_spill]] }
  0x34   : > { %s3465_s12 = scalar_lea.sflag [#allocation3], %s493_s0 }
  0x35   : > { %p3028_p10 = pneg %p3458_p7 }
  0x38   : > { %s502_s22 = scalar_lea.hbm %s3927_s11, %s2669_s25 }
  0x39   : > { %s503_s9 = sshll.u32 %s502_s22, 4  ;;  %s415_s26 = sshll.u32 %s3929_s2, 4  ;;  %s504_s9 = int_to_ptr.hbm [resolvable:$true] %s503_s9  ;;  %s416_s26 = int_to_ptr.hbm [resolvable:$true] %s415_s26 }
  0x3a   : > { %s3024_s3 = sshra.s32 %s504_s9, 4  ;;  %s3031_s22 = scalar_lea.hbm %s3927_s11, 64  ;;  %s3025_s3 = int_to_ptr.hbm [resolvable:$true] %s3024_s3 }
  0x3b   : > { %s3026_s29 = scalar_lea.hbm %s3025_s3, 32  ;;  %p3032_p2 = scmp.lt.s32.totalorder %s3025_s3, %s3927_s11 }
  0x3c   : > { %p3027_p9 = scmp.ne.s32.totalorder %s3025_s3, %s3026_s29  ;;  %p3033_p8 = scmp.lt.s32.totalorder %s3031_s22, %s3026_s29 }
  0x3e   : > { %p3029_p11 = pnand %p3028_p10, %p3027_p9  ;;  %p3034_p5 = por %p3033_p8, %p3032_p2 }
  0x40   : > { %p3030_p12 = pneg %p3029_p11 }
  0x42   : > { %p3035_p1 = pnand %p3034_p5, %p3030_p12 }
  0x44   : > { %3038 = shalt.err (!%p3035_p1)
}
  0x45   : > { %s3265_s19 = smov 64   ;;  %s3266_s23 = smov 4  }
  0x46   : > { %2830 = dma.hbm_to_vmem [thread:$0]  (!%p3458_p7), %s504_s9, 512, %s506_s14, %s3465_s12, %s3265_s19, %s3265_s19, %s3266_s23  }
  0x47   : > { %s3267_s0 = smov [#allocation7]   ;;  %s3930_s4 = sld [smem:[#allocation31_spill]] }
  0x48   : > { %s417_s24 = sshll.u32 %s3267_s0, 4  ;;  %s3931_s29 = smov 8   ;;  %s418_s24 = int_to_ptr.vmem [resolvable:$true] %s417_s24 }
  0x49   : > { %s3932_s22 = smov 128   ;;  %s3933_s7 = sld [smem:[#allocation33_spill]] }
  0x4a   : > { %2817 = dma.hbm_to_vmem [thread:$0]  (!%p3394_p6), %s416_s26, 256, %s418_s24, [#allocation6], %s3932_s22, %s3932_s22, %s3931_s29  }
  0x4b   : > { %s3268_s9 = smov [#allocation10]   ;;  %s3269_s2 = smov [#allocation11]  }
  0x4c   : > { %s445_s14 = sshll.u32 %s3268_s9, 4  ;;  %s465_s0 = sshll.u32 %s3269_s2, 4  ;;  %s446_s14 = int_to_ptr.vmem [resolvable:$true] %s445_s14  ;;  %s466_s0 = int_to_ptr.vmem [resolvable:$true] %s465_s0 }
  0x4d   : > { %s443_s3 = sshll.u32 %s3930_s4, 4  ;;  %s3934_s25 = sand.u32 1, %s3252_s15   ;;  %s444_s3 = int_to_ptr.hbm [resolvable:$true] %s443_s3 }
  0x4e   : > { %2823 = dma.hbm_to_vmem [thread:$0]  (!%p3394_p6), %s444_s3, 256, %s446_s14, [#allocation9], %s3932_s22, %s3932_s22, %s3931_s29  }
  0x4f   : > { %s463_s11 = sshll.u32 %s3933_s7, 4  ;;  %s2223_s4 = sshll.u32 %s3934_s25, 8  ;;  %s464_s11 = int_to_ptr.hbm [resolvable:$true] %s463_s11 }
  0x50   : > { %2826 = dma.hbm_to_vmem [thread:$0]  (!%p3394_p6), %s464_s11, 2048, %s466_s0, [#allocation12], %s3265_s19, %s3265_s19, %s3266_s23  }
  0x51   : > { %s2670_s26 = sshll.u32 %s3256_s16, 8  ;;  %s527_s24 = scalar_lea.vmem [#allocation14], %s2223_s4 }
  0x52   : > { %s535_s17 = sshll.u32 %s527_s24, 4  ;;  %s532_s7 = scalar_lea.hbm %s3886_s13, %s2670_s26  ;;  %s536_s17 = int_to_ptr.vmem [resolvable:$true] %s535_s17 }
  0x53   : > { %s533_s6 = sshll.u32 %s532_s7, 4  ;;  %s3151_s4 = scalar_lea.hbm %s3886_s13, 512  ;;  %s534_s6 = int_to_ptr.hbm [resolvable:$true] %s533_s6 }
  0x54   : > { %s3144_s10 = sshra.s32 %s534_s6, 4  ;;  %s3145_s10 = int_to_ptr.hbm [resolvable:$true] %s3144_s10 }
  0x55   : > { %s3146_s3 = scalar_lea.hbm %s3145_s10, 256  ;;  %p3152_p6 = scmp.lt.s32.totalorder %s3145_s10, %s3886_s13 }
  0x56   : > { %p3147_p1 = scmp.ne.s32.totalorder %s3145_s10, %s3146_s3  ;;  %p3153_p11 = scmp.lt.s32.totalorder %s3151_s4, %s3146_s3 }
  0x58   : > { %p3149_p5 = pnand %p3147_p1, %p3028_p10  ;;  %p3154_p12 = por %p3153_p11, %p3152_p6 }
  0x5a   : > { %p3150_p9 = pneg %p3149_p5 }
  0x5c   : > { %p3155_p2 = pnand %p3154_p12, %p3150_p9 }
  0x5e   : > { %3158 = shalt.err (!%p3155_p2)
}
  0x5f   : > { %2833 = dma.hbm_to_vmem [thread:$0]  (!%p3458_p7), %s534_s6, 4096, %s536_s17, %s3465_s12, %s3932_s22, %s3932_s22, %s3931_s29  }
  0x60   : > { %547 = sbr.rel (%p3382_p3) target bundleno = 1418 (0x58a), region = 76  ;;  %p3935_p10 = scmp.eq.s32.totalorder (!%p3382_p3), %s3377_s20, 0 }
  0x65   : > { %3219 = dma.done.wait (%p3935_p10), [#allocation3], 512   ;;  %p3936_p8 = pmov %p3935_p10 }
  0x67   : > { %3221 = vsyncadd (%p3936_p8), [#allocation3], 4294966784  ;;  %p3937_p1 = pmov %p3936_p8 }
  0x69   : > { %3223 = dma.done.wait (%p3937_p1), [#allocation6], 512   ;;  %p3938_p5 = pmov %p3937_p1 }
  0x6a   : > { %p3939_p9 = pmov %p3937_p1 }
  0x6b   : > { %3225 = vsyncadd (%p3938_p5), [#allocation6], 4294966784 }
  0x6c   : > { %3227 = dma.done.wait (%p3939_p9), [#allocation9], 512   ;;  %p3940_p7 = pmov %p3937_p1 }
  0x6d   : > { %p3941_p3 = pmov %p3937_p1 }
  0x6e   : > { %3229 = vsyncadd (%p3940_p7), [#allocation9], 4294966784 }
  0x6f   : > { %3231 = dma.done.wait (%p3941_p3), [#allocation12], 2048   ;;  %p3942_p6 = pmov %p3937_p1 }
  0x70   : > { %s579_s6 = sand.u32 1, %s3377_s20   ;;  %s3540_s7 = sand.u32 1, %s3248_s30  }
  0x71   : > { %3233 = vsyncadd (%p3942_p6), [#allocation12], 4294965248  ;;  %s2233_s10 = sshll.u32 %s3540_s7, 5  ;;  %s580_s12 = scalar_lea.sflag [#allocation3], %s579_s6 }
  0x72   : > { %s3545_s21 = scalar_lea.vmem [#allocation13], %s2233_s10 }
  0x73   : > { %3235 = dma.done.wait (%p3435_p13), %s580_s12, 4608  }
  0x74   : > { %3237 = vsyncadd (%p3435_p13), %s580_s12, 4294962688  ;;  %v2680_v0 = vld [vmem:[#allocation11 + $0x38] sm:$0xff]  ;;  %v2679_v2 = vld [vmem:[#allocation11 + $0x30] sm:$0xff]  ;;  %s3270_s1 = smov 112   ;;  %s3271_s22 = smov 16   ;;  %vm1234_vm0 = vcmask 523264  }
  0x75   : > { %v2688_v1 = vld [vmem:[#allocation11 + $0x78] sm:$0xff]  ;;  %799 = vmatpush.bf16.msra.mxu0 %v2680_v0  ;;  %v2687_v3 = vld [vmem:[#allocation11 + $0x70] sm:$0xff]  ;;  %v2678_v4 = vld [vmem:[#allocation11 + $0x28] sm:$0xff]  ;;  %p654_p13 = scmp.lt.s32.totalorder %s3377_s20, 1  ;;  %s3943_s26 = sld [smem:[#allocation35_spill]]  ;;  %vm1516_vm8 = vcmask 261120  }
  0x76   : > { %813 = vmatpush.bf16.msra.mxu1 %v2688_v1  ;;  %v2686_v5 = vld [vmem:[#allocation11 + $0x68] sm:$0xff]  ;;  %v2677_v6 = vld [vmem:[#allocation11 + $0x20] sm:$0xff]  ;;  %v2676_v8 = vld [vmem:[#allocation11 + $0x18] sm:$0xff]  ;;  %s3944_s9 = sld [smem:[#allocation32_spill]]  ;;  %s3273_s23 = smov 96   ;;  %vm1543_vm10 = vcmask 130048  }
  0x77   : > { %v2685_v7 = vld [vmem:[#allocation11 + $0x60] sm:$0xff]  ;;  %v2684_v9 = vld [vmem:[#allocation11 + $0x58] sm:$0xff]  ;;  %v2675_v10 = vld [vmem:[#allocation11 + $0x10] sm:$0xff]  ;;  %s3673_s14 = scalar_select %p654_p13, %s3377_s20, 1 }
  0x78   : > { %v2683_v11 = vld [vmem:[#allocation11 + $0x50] sm:$0xff]  ;;  %v2696_v12 = vld [vmem:[%s3881_s8 + $0x38] sm:$0xff]  ;;  %v2674_v14 = vld [vmem:[#allocation11 + $0x8] sm:$0xff]  ;;  %s3945_s4 = sld [smem:[#allocation37_spill]]  ;;  %s3274_s6 = smov 32  }
  0x79   : > { %800 = vmatpush.bf16.msra.mxu0 %v2679_v2  ;;  %v2704_v13 = vld [vmem:[%s3881_s8 + $0x78] sm:$0xff]  ;;  %1000 = vmatpush.bf16.msra.mxu2 %v2696_v12  ;;  %v2682_v15 = vld [vmem:[#allocation11 + $0x48] sm:$0xff]  ;;  %v2695_v16 = vld [vmem:[%s3881_s8 + $0x30] sm:$0xff]  ;;  %s2671_s2 = sshll.u32 %s3673_s14, 5  ;;  %s2672_s3 = sshll.u32 %s3673_s14, 7 }
  0x7a   : > { %814 = vmatpush.bf16.msra.mxu1 %v2687_v3  ;;  %1014 = vmatpush.bf16.msra.mxu3 %v2704_v13  ;;  %v2703_v17 = vld [vmem:[%s3881_s8 + $0x70] sm:$0xff]  ;;  %v2673_v18 = vld [vmem:[#allocation11] sm:$0xff]  ;;  %v2712_v20 = vld [vmem:[%s3878_s5 + $0x38] sm:$0xff]  ;;  %s3276_s12 = smov 80   ;;  %s3946_s18 = sld [smem:[#allocation34_spill]] }
  0x7b   : > { %v2681_v19 = vld [vmem:[#allocation11 + $0x40] sm:$0xff]  ;;  %v667_v22 = vld [vmem:[#allocation2 + $0x10] sm:$0xff]  ;;  %v666_v23 = vld [vmem:[#allocation2 + $0x8] sm:$0xff]  ;;  %s658_s24 = scalar_lea.vmem %s3943_s26, %s2671_s2  ;;  %s2234_s29 = sshll.u32 %s3540_s7, 8 }
  0x7c   : > { %v665_v21 = vld [vmem:[#allocation2] sm:$0xff]  ;;  %v668_v24 = vld [vmem:[#allocation2 + $0x18] sm:$0xff]  ;;  %v2694_v26 = vld [vmem:[%s3881_s8 + $0x28] sm:$0xff]  ;;  %s3771_s14 = scalar_lea.vmem [#allocation14], %s2234_s29  ;;  %s653_s2 = scalar_lea.vmem [#allocation15], %s2233_s10 }
  0x7d   : > { %801 = vmatpush.bf16.msra.mxu0 %v2678_v4  ;;  %1001 = vmatpush.bf16.msra.mxu2 %v2695_v16  ;;  %v2720_v25 = vld [vmem:[%s3878_s5 + $0x78] sm:$0xff]  ;;  %v2702_v27 = vld [vmem:[%s3881_s8 + $0x68] sm:$0xff]  ;;  %v669_v28 = vpack.c.bf16 %v667_v22, %v665_v21  ;;  %v670_v29 = vpack.c.bf16 %v668_v24, %v666_v23  ;;  %v2693_v30 = vld [vmem:[%s3881_s8 + $0x20] sm:$0xff]  ;;  %s2777_s0 = sshll.u32 %s3377_s20, 5  ;;  %s2022_s20 = scalar_lea.sflag [#allocation4], %s3540_s7 }
  0x7e   : > { %815 = vmatpush.bf16.msra.mxu1 %v2686_v5  ;;  %1015 = vmatpush.bf16.msra.mxu3 %v2703_v17  ;;  %v2701_v31 = vld [vmem:[%s3881_s8 + $0x60] sm:$0xff]  ;;  %v2711_v32 = vld [vmem:[%s3878_s5 + $0x30] sm:$0xff]  ;;  %v2692_v35 = vld [vmem:[%s3881_s8 + $0x18] sm:$0xff]  ;;  %s3698_s19 = scalar_lea.vmem %s3945_s4, %s2672_s3 }
  0x7f   : > { %v2719_v33 = vld [vmem:[%s3878_s5 + $0x70] sm:$0xff]  ;;  %v2700_v36 = vld [vmem:[%s3881_s8 + $0x58] sm:$0xff]  ;;  %v2710_v37 = vld [vmem:[%s3878_s5 + $0x28] sm:$0xff] }
  0x80   : > { %v1030_v34 = vld [vmem:[#allocation10] sm:$0xff]  ;;  %v2718_v38 = vld [vmem:[%s3878_s5 + $0x68] sm:$0xff]  ;;  %v2709_v41 = vld [vmem:[%s3878_s5 + $0x20] sm:$0xff] }
  0x81   : > { %802 = vmatpush.bf16.msra.mxu0 %v2677_v6  ;;  %1002 = vmatpush.bf16.msra.mxu2 %v2694_v26  ;;  %v2691_v39 = vld [vmem:[%s3881_s8 + $0x10] sm:$0xff]  ;;  %v2717_v42 = vld [vmem:[%s3878_s5 + $0x60] sm:$0xff]  ;;  %v2690_v43 = vld [vmem:[%s3881_s8 + $0x8] sm:$0xff] }
  0x82   : > { %816 = vmatpush.bf16.msra.mxu1 %v2685_v7  ;;  %1016 = vmatpush.bf16.msra.mxu3 %v2702_v27  ;;  %v2699_v40 = vld [vmem:[%s3881_s8 + $0x50] sm:$0xff]  ;;  %v2698_v44 = vld [vmem:[%s3881_s8 + $0x48] sm:$0xff]  ;;  %v2708_v45 = vld [vmem:[%s3878_s5 + $0x18] sm:$0xff] }
  0x83   : > { %1055 = vrot.lane.b32.xlu1 %v1030_v34, %s3270_s1  ;;  %v2716_v46 = vld [vmem:[%s3878_s5 + $0x58] sm:$0xff]  ;;  %v2689_v47 = vld [vmem:[%s3881_s8] sm:$0xff]  ;;  %v2707_v49 = vld [vmem:[%s3878_s5 + $0x10] sm:$0xff] }
  0x84   : > { %v2697_v48 = vld [vmem:[%s3881_s8 + $0x40] sm:$0xff]  ;;  %v2715_v50 = vld [vmem:[%s3878_s5 + $0x50] sm:$0xff]  ;;  %v2706_v51 = vld [vmem:[%s3878_s5 + $0x8] sm:$0xff]  ;;  %1036 = vrot.lane.b32.xlu2 %v1030_v34, %s3271_s22 }
  0x85   : > { %803 = vmatpush.bf16.msra.mxu0 %v2676_v8  ;;  %1003 = vmatpush.bf16.msra.mxu2 %v2693_v30  ;;  %v2714_v52 = vld [vmem:[%s3878_s5 + $0x48] sm:$0xff]  ;;  %v2705_v53 = vld [vmem:[%s3878_s5] sm:$0xff]  ;;  %v1031_v0 = vld [vmem:[#allocation10 + $0x8] sm:$0xff] }
  0x86   : > { %817 = vmatpush.bf16.msra.mxu1 %v2684_v9  ;;  %1017 = vmatpush.bf16.msra.mxu3 %v2701_v31  ;;  %v2713_v54 = vld [vmem:[%s3878_s5 + $0x40] sm:$0xff]  ;;  %v2743_v21 = vld [vmem:[%s3545_s21 + $0x10] sm:$0xff]  ;;  %v2742_v24 = vld [vmem:[%s3545_s21 + $0x8] sm:$0xff] }
  0x87   : > { %v2723_v22 = vld [vmem:[%s658_s24 + $0x10] sm:$0xff]  ;;  %v2741_v27 = vld [vmem:[%s3545_s21] sm:$0xff] }
  0x89   : > { %804 = vmatpush.bf16.msra.mxu0 %v2675_v10  ;;  %1004 = vmatpush.bf16.msra.mxu2 %v2692_v35 }
  0x8a   : > { %818 = vmatpush.bf16.msra.mxu1 %v2683_v11  ;;  %1018 = vmatpush.bf16.msra.mxu3 %v2700_v36 }
  0x8b   : > { %1057 = vrot.lane.b32.xlu1 %v1031_v0, %s3270_s1 }
  0x8c   : > { %1038 = vrot.lane.b32.xlu2 %v1031_v0, %s3271_s22  ;;  %v2739_v0 = vld [vmem:[%s3698_s19 + $0x74] sm:$0xf] }
  0x8d   : > { %805 = vmatpush.bf16.msra.mxu0 %v2674_v14  ;;  %1005 = vmatpush.bf16.msra.mxu2 %v2691_v39  ;;  %v3272_v14 = vmov 64.0  }
  0x8e   : > { %819 = vmatpush.bf16.msra.mxu1 %v2682_v15  ;;  %1019 = vmatpush.bf16.msra.mxu3 %v2699_v40  ;;  %2906 = vrcp.f32 %v3272_v14 }
  0x91   : > { %806 = vmatpush.bf16.msra.mxu0 %v2673_v18  ;;  %1006 = vmatpush.bf16.msra.mxu2 %v2690_v43  ;;  %v2744_v18 = vld [vmem:[%s3545_s21 + $0x18] sm:$0xff] }
  0x92   : > { %820 = vmatpush.bf16.msra.mxu1 %v2681_v19  ;;  %1020 = vmatpush.bf16.msra.mxu3 %v2698_v44  ;;  %v2724_v19 = vld [vmem:[%s658_s24 + $0x18] sm:$0xff] }
  0x94   : > { %807 = vmatmul.bf16.vlgmr.msra.gmra.mxu0 %v669_v28  ;;  %v2907_v15 = vpop.eup %2906 }
  0x95   : > { %1203 = vmatpush.bf16.msrb.mxu0 %v2712_v20  ;;  %821 = vmatmul.bf16.vlgmr.msra.gmra.mxu1 %v670_v29  ;;  %v1242_v16 = vmul.f32 64.0, %v2907_v15  ;;  %vm1246_vm1 = vweird.f32 %v2907_v15 }
  0x96   : > { %1217 = vmatpush.bf16.msrb.mxu1 %v2720_v25  ;;  %1007 = vmatpush.bf16.msra.mxu2 %v2689_v47  ;;  %v2722_v25 = vld [vmem:[%s658_s24 + $0x8] sm:$0xff] }
  0x97   : > { %1021 = vmatpush.bf16.msra.mxu3 %v2697_v48  ;;  %v1243_v17 = vsub.f32 1.0, %v1242_v16  ;;  %v2483_v16 = vld [vmem:[%s3698_s19 + $0x40] sm:$0xf] }
  0x99   : > { %1204 = vmatpush.bf16.msrb.mxu0 %v2711_v32  ;;  %1008 = vmatmul.bf16.vlgmr.msra.gmra.mxu2 %v669_v28  ;;  %v1244_v20 = vmul.f32 %v2907_v15, %v1243_v17  ;;  %v2734_v17 = vld [vmem:[%s3698_s19 + $0x44] sm:$0xf0] }
  0x9a   : > { %1218 = vmatpush.bf16.msrb.mxu1 %v2719_v33  ;;  %1022 = vmatmul.bf16.vlgmr.msra.gmra.mxu3 %v670_v29 }
  0x9b   : > { %1319 = vmatpush.bf16.msrb.mxu2 %v2724_v19  ;;  %v1245_v23 = vadd.f32 %v2907_v15, %v1244_v20  ;;  %v2733_v19 = vld [vmem:[%s3698_s19 + $0x44] sm:$0xf]  ;;  %v2485_v20 = vld [vmem:[%s3698_s19 + $0x48] sm:$0xf0] }
  0x9d   : > { %1205 = vmatpush.bf16.msrb.mxu0 %v2710_v37  ;;  %v1247_v26 = vsel %vm1246_vm1, %v2907_v15, %v1245_v23  ;;  %v2493_v15 = vld [vmem:[%s3698_s19 + $0x58] sm:$0xf0]  ;;  %v2475_v23 = vld [vmem:[%s3698_s19 + $0x30] sm:$0xf] }
  0x9e   : > { %1219 = vmatpush.bf16.msrb.mxu1 %v2718_v38 }
  0x9f   : > { %1320 = vmatpush.bf16.msrb.mxu2 %v2723_v22  ;;  %v2488_v22 = vor.u32 %v2733_v19, %v2485_v20 }
  0xa1   : > { %1206 = vmatpush.bf16.msrb.mxu0 %v2709_v41 }
  0xa2   : > { %1220 = vmatpush.bf16.msrb.mxu1 %v2717_v42 }
  0xa3   : > { %1321 = vmatpush.bf16.msrb.mxu2 %v2722_v25  ;;  %v2731_v25 = vld [vmem:[%s3698_s19 + $0x34] sm:$0xf] }
  0xa5   : > { %1207 = vmatpush.bf16.msrb.mxu0 %v2708_v45 }
  0xa6   : > { %1221 = vmatpush.bf16.msrb.mxu1 %v2716_v46 }
  0xa9   : > { %1208 = vmatpush.bf16.msrb.mxu0 %v2707_v49 }
  0xaa   : > { %1222 = vmatpush.bf16.msrb.mxu1 %v2715_v50 }
  0xad   : > { %1209 = vmatpush.bf16.msrb.mxu0 %v2706_v51 }
  0xae   : > { %1223 = vmatpush.bf16.msrb.mxu1 %v2714_v52 }
  0xb1   : > { %1210 = vmatpush.bf16.msrb.mxu0 %v2705_v53 }
  0xb2   : > { %1224 = vmatpush.bf16.msrb.mxu1 %v2713_v54  ;;  %v2904_v54 = vld [vmem:[%s3944_s9] ss:$0 sm:$0xff]  ;;  %s2034_s9 = sshll.u32 %s653_s2, 4  ;;  %s2035_s9 = int_to_ptr.vmem [resolvable:$true] %s2034_s9 }
  0xb4   : > { %1211 = vmatmul.bf16.vlgmr.msrb.gmra.mxu0 %v669_v28  ;;  %v2721_v28 = vld [vmem:[%s658_s24] sm:$0xff]  ;;  %s3947_s24 = sld [smem:[#allocation38_spill]] }
  0xb5   : > { %1225 = vmatmul.bf16.vlgmr.msrb.gmra.mxu1 %v670_v29  ;;  %1492 = vmatpush.bf16.msra.mxu0 %v2744_v18 }
  0xb6   : > { %1322 = vmatpush.bf16.msrb.mxu2 %v2721_v28 }
  0xb9   : > { %1493 = vmatpush.bf16.msra.mxu0 %v2743_v21  ;;  %v2484_v21 = vor.u32 %v2734_v17, %v2483_v16  ;;  %v1524_v16 = vld [vmem:[#allocation7 + $0x8] sm:$0xff] }
  0xba   : > { %s2033_s17 = scalar_lea.hbm %s3947_s24, %s2777_s0 }
  0xbb   : > { %s2036_s3 = sshll.u32 %s2033_s17, 4  ;;  %s2037_s3 = int_to_ptr.hbm [resolvable:$true] %s2036_s3 }
  0xbc   : > { %s3188_s10 = sshra.s32 %s2037_s3, 4  ;;  %s3189_s10 = int_to_ptr.hbm [resolvable:$true] %s3188_s10 }
  0xbd   : > { %1494 = vmatpush.bf16.msra.mxu0 %v2742_v24  ;;  %v2732_v24 = vld [vmem:[%s3698_s19 + $0x34] sm:$0xf0]  ;;  %s3190_s27 = scalar_lea.hbm %s3189_s10, 32  ;;  %p3195_p10 = scmp.lt.s32.totalorder %s3189_s10, %s3947_s24 }
  0xbe   : > { %p3191_p11 = scmp.ne.s32.totalorder %s3189_s10, %s3190_s27 }
  0xc0   : > { %p3192_p12 = pnand %p3191_p11, %p3439_p0 }
  0xc1   : > { %1495 = vmatpush.bf16.msra.mxu0 %v2741_v27  ;;  %v2477_v27 = vld [vmem:[%s3698_s19 + $0x38] sm:$0xf0] }
  0xc2   : > { %v2480_v28 = vor.u32 %v2731_v25, %v2477_v27  ;;  %p3193_p2 = pneg %p3192_p12 }
  0xf5   : > { %v1056_v11 = vpop.permute.xlu1 %1055 }
  0xfd   : > { %v1058_v33 = vpop.permute.xlu1 %1057 }
 0x111   : > { %v808_v55 = vpop.f32.mrf.mxu0 }
 0x112   : > { %v822_v56 = vpop.f32.mrf.mxu1 }
 0x113   : > { %v3649_v57 = vadd.f32 %v822_v56, %v808_v55 }
 0x119   : > { %v810_v58 = vpop.f32.mrf.mxu0 }
 0x11a   : > { %v824_v59 = vpop.f32.mrf.mxu1 }
 0x11b   : > { %v3651_v60 = vadd.f32 %v824_v59, %v810_v58 }
 0x11c   : > { %v1009_v8 = vpop.f32.mrf.mxu2 }
 0x11d   : > { %v1023_v9 = vpop.f32.mrf.mxu3  ;;  %v829_v13 = vmul.f32 %v3651_v60, %v3651_v60 }
 0x11e   : > { %v3665_v10 = vadd.f32 %v1023_v9, %v1009_v8 }
 0x120   : > { %v1061_v12 = vmul.f32 %v1056_v11, %v3665_v10  ;;  %v2491_v11 = vld [vmem:[%s3698_s19 + $0x50] sm:$0xf] }
 0x124   : > { %v1011_v29 = vpop.f32.mrf.mxu2 }
 0x125   : > { %v1025_v30 = vpop.f32.mrf.mxu3 }
 0x126   : > { %v3683_v32 = vadd.f32 %v1025_v30, %v1011_v29  ;;  %v2467_v29 = vld [vmem:[%s3698_s19 + $0x20] sm:$0xf]  ;;  %v2730_v30 = vld [vmem:[%s3698_s19 + $0x24] sm:$0xf0] }
 0x128   : > { %v1062_v35 = vmul.f32 %v1058_v33, %v3683_v32  ;;  %v2468_v33 = vor.u32 %v2730_v30, %v2467_v29 }
 0x12a   : > { %1067 = vrot.lane.b32.xlu1 %v1062_v35, %s3271_s22 }
 0x131   : > { %v1212_v61 = vpop.f32.mrf.mxu0 }
 0x132   : > { %v1226_v62 = vpop.f32.mrf.mxu1 }
 0x133   : > { %v3653_v63 = vadd.f32 %v1226_v62, %v1212_v61  ;;  %v2507_v62 = vld [vmem:[%s3698_s19 + $0x70] sm:$0xf] }
 0x135   : > { %v1232_v1 = vmul.f32 %v3653_v63, %v3653_v63 }
 0x137   : > { %v1235_v2 = vsel %vm1234_vm0, %v1232_v1, 0.0 }
 0x138   : > { %1236 = vadd.xlane.f32.xlu0 %v1235_v2  ;;  %v2509_v2 = vld [vmem:[%s3698_s19 + $0x78] sm:$0xf0] }
 0x139   : > { %v1214_v3 = vpop.f32.mrf.mxu0 }
 0x13a   : > { %v1228_v4 = vpop.f32.mrf.mxu1 }
 0x13b   : > { %v3660_v5 = vadd.f32 %v1228_v4, %v1214_v3  ;;  %v2499_v3 = vld [vmem:[%s3698_s19 + $0x60] sm:$0xf]  ;;  %v2738_v4 = vld [vmem:[%s3698_s19 + $0x64] sm:$0xf0] }
 0x13c   : > { %v2500_v8 = vor.u32 %v2738_v4, %v2499_v3  ;;  %v828_v4 = vmul.f32 %v3649_v57, %v3649_v57 }
 0x13d   : > { %v1233_v6 = vmul.f32 %v3660_v5, %v3660_v5 }
 0x13f   : > { %v1238_v7 = vsel %vm1234_vm0, %v1233_v6, 0.0  ;;  %v2737_v6 = vld [vmem:[%s3698_s19 + $0x64] sm:$0xf] }
 0x140   : > { %1239 = vadd.xlane.f32.xlu0 %v1238_v7  ;;  %v2501_v7 = vld [vmem:[%s3698_s19 + $0x68] sm:$0xf0] }
 0x141   : > { %v2504_v9 = vor.u32 %v2737_v6, %v2501_v7  ;;  %v3275_v6 = vmov 128.0  }
 0x154   : > { %1065 = vrot.lane.b32.xlu0 %v1061_v12, %s3271_s22  ;;  %v2736_v12 = vld [vmem:[%s3698_s19 + $0x54] sm:$0xf0] }
 0x155   : > { %v2492_v14 = vor.u32 %v2736_v12, %v2491_v11  ;;  %v1519_v11 = vld [vmem:[#allocation5] sm:$0xff] }
 0x17e   : > { %832 = vadd.xlane.f32.xlu0 %v829_v13  ;;  %v2735_v13 = vld [vmem:[%s3698_s19 + $0x54] sm:$0xf] }
 0x17f   : > { %v2496_v18 = vor.u32 %v2735_v13, %v2493_v15  ;;  %v1520_v15 = vld [vmem:[#allocation5 + $0x8] sm:$0xff] }
 0x1ab   : > { %v1237_v31 = vpop.xlane.xlu0 %1236 }
 0x1ac   : > { %v1248_v34 = vmul.f32 %v1247_v26, %v1237_v31  ;;  %v2729_v31 = vld [vmem:[%s3698_s19 + $0x24] sm:$0xf] }
 0x1ae   : > { %v1250_v36 = vadd.f32 1e-06, %v1248_v34  ;;  %v2469_v34 = vld [vmem:[%s3698_s19 + $0x28] sm:$0xf0] }
 0x1af   : > { %v2472_v35 = vor.u32 %v2729_v31, %v2469_v34 }
 0x1b0   : > { %2908 = vrsqrt.f32 %v1250_v36  ;;  %vm1258_vm3 = vweird.f32 %v1250_v36 }
 0x1b3   : > { %v1240_v37 = vpop.xlane.xlu0 %1239 }
 0x1b4   : > { %v1249_v38 = vmul.f32 %v1247_v26, %v1240_v37  ;;  %v2476_v26 = vor.u32 %v2732_v24, %v2475_v23  ;;  %v2728_v37 = vld [vmem:[%s3698_s19 + $0x14] sm:$0xf0] }
 0x1b6   : > { %v2909_v39 = vpop.eup %2908  ;;  %v1251_v40 = vadd.f32 1e-06, %v1249_v38  ;;  %v2727_v38 = vld [vmem:[%s3698_s19 + $0x14] sm:$0xf] }
 0x1b7   : > { %v1253_v41 = vmul.f32 %v2909_v39, %v1250_v36  ;;  %vm1259_vm2 = vweird.f32 %v2909_v39  ;;  %v2459_v36 = vld [vmem:[%s3698_s19 + $0x10] sm:$0xf] }
 0x1b8   : > { %2910 = vrsqrt.f32 %v1251_v40  ;;  %vm1260_vm4 = vmor %vm1258_vm3, %vm1259_vm2  ;;  %vm1268_vm6 = vweird.f32 %v1251_v40 }
 0x1b9   : > { %v1254_v42 = vmul.f32 %v2909_v39, %v1253_v41  ;;  %2912 = vrcp.f32 %v3275_v6 }
 0x1bb   : > { %v1255_v43 = vmul.f32 0.5, %v1254_v42  ;;  %v2451_v42 = vld [vmem:[%s3698_s19] sm:$0xf] }
 0x1bd   : > { %v1256_v44 = vsub.f32 1.5, %v1255_v43  ;;  %v2726_v43 = vld [vmem:[%s3698_s19 + $0x4] sm:$0xf0] }
 0x1be   : > { %v2911_v45 = vpop.eup %2910 }
 0x1bf   : > { %v1263_v46 = vmul.f32 %v2911_v45, %v1251_v40  ;;  %v1257_v47 = vmul.f32 %v2909_v39, %v1256_v44  ;;  %vm1269_vm5 = vweird.f32 %v2911_v45  ;;  %v2461_v40 = vld [vmem:[%s3698_s19 + $0x18] sm:$0xf0]  ;;  %v2725_v44 = vld [vmem:[%s3698_s19 + $0x4] sm:$0xf] }
 0x1c0   : > { %vm1270_vm7 = vmor %vm1268_vm6, %vm1269_vm5  ;;  %v2464_v41 = vor.u32 %v2727_v38, %v2461_v40 }
 0x1c1   : > { %v1264_v48 = vmul.f32 %v2911_v45, %v1263_v46  ;;  %v1261_v50 = vsel %vm1260_vm4, %v2909_v39, %v1257_v47  ;;  %v2460_v39 = vor.u32 %v2728_v37, %v2459_v36  ;;  %v2453_v46 = vld [vmem:[%s3698_s19 + $0x8] sm:$0xf0] }
 0x1c2   : > { %v1272_v53 = vmul.f32 %v1261_v50, %v3653_v63  ;;  %v2740_v63 = vld [vmem:[%s3698_s19 + $0x74] sm:$0xf0]  ;;  %v2456_v47 = vor.u32 %v2725_v44, %v2453_v46  ;;  %s3194_s19 = scalar_lea.hbm %s3947_s24, 64 }
 0x1c3   : > { %v1265_v49 = vmul.f32 0.5, %v1264_v48  ;;  %v2508_v1 = vor.u32 %v2740_v63, %v2507_v62  ;;  %v1068_v63 = vpop.permute.xlu1 %1067  ;;  %p3196_p8 = scmp.lt.s32.totalorder %s3194_s19, %s3190_s27 }
 0x1c4   : > { %v1277_v58 = vmul.f32 %v2904_v54, %v1272_v53  ;;  %v1037_v53 = vpop.permute.xlu2 %1036 }
 0x1c5   : > { %v1266_v51 = vsub.f32 1.5, %v1265_v49  ;;  %1426 = vmatpush.bf16.msrb.mxu3 %v2508_v1  ;;  %p3197_p1 = por %p3196_p8, %p3195_p10 }
 0x1c7   : > { %v1267_v52 = vmul.f32 %v2911_v45, %v1266_v51  ;;  %p3198_p5 = pnand %p3197_p1, %p3193_p2 }
 0x1c9   : > { %v1271_v55 = vsel %vm1270_vm7, %v2911_v45, %v1267_v52  ;;  %1427 = vmatpush.bf16.msrb.mxu3 %v2500_v8  ;;  %v2452_v45 = vor.u32 %v2726_v43, %v2451_v42  ;;  %v1523_v8 = vld [vmem:[#allocation7] sm:$0xff] }
 0x1ca   : > { %v1273_v56 = vmul.f32 %v1271_v55, %v3660_v5  ;;  %v2512_v5 = vor.u32 %v2739_v0, %v2509_v2  ;;  %v1028_v55 = vld [vmem:[#allocation8] sm:$0xff]  ;;  %v1066_v0 = vpop.permute.xlu0 %1065 }
 0x1cc   : > { %v1278_v59 = vmul.f32 %v2904_v54, %v1273_v56  ;;  %1440 = vmatpush.bf16.msra.mxu2 %v2512_v5  ;;  %v1042_v54 = vmul.f32 %v1037_v53, %v3665_v10  ;;  %v1039_v56 = vpop.permute.xlu2 %1038 }
 0x1cd   : > { %1428 = vmatpush.bf16.msrb.mxu3 %v2492_v14 }
 0x1ce   : > { %v1279_v61 = vpack.c.bf16 %v1278_v59, %v1277_v58  ;;  %v1029_v58 = vld [vmem:[#allocation8 + $0x8] sm:$0xff]  ;;  %v1032_v59 = vmul.f32 %v1028_v55, %v3665_v10 }
 0x1cf   : > { %v1033_v62 = vmul.f32 %v1029_v58, %v3683_v32 }
 0x1d0   : > { %2448 = vmatmul.msk.bf16.vlgmr.msrb.gmra.mxu2 %vm1234_vm0, %v1279_v61  ;;  %2529 = vmatmul.msk.bf16.vlgmr.msra.gmra.mxu0 %vm1234_vm0, %v1279_v61  ;;  %v1043_v61 = vmul.f32 %v1039_v56, %v3683_v32  ;;  %v1071_v1 = vadd.f32 %v1066_v0, %v1032_v59  ;;  %v2913_v32 = vpop.eup %2912 }
 0x1d1   : > { %1441 = vmatpush.bf16.msra.mxu2 %v2504_v9  ;;  %1429 = vmatpush.bf16.msrb.mxu3 %v2484_v21  ;;  %v1072_v2 = vadd.f32 %v1068_v63, %v1033_v62  ;;  %v835_v12 = vmul.f32 128.0, %v2913_v32  ;;  %vm839_vm9 = vweird.f32 %v2913_v32 }
 0x1d3   : > { %v1073_v3 = vpack.c.bf16 %v1072_v2, %v1071_v1  ;;  %v836_v17 = vsub.f32 1.0, %v835_v12  ;;  %v2905_v1 = vld [vmem:[%s3946_s18] ss:$0 sm:$0xff] }
 0x1d5   : > { %1442 = vmatpush.bf16.msra.mxu2 %v2496_v18  ;;  %1430 = vmatpush.bf16.msrb.mxu3 %v2476_v26  ;;  %v837_v23 = vmul.f32 %v2913_v32, %v836_v17 }
 0x1d7   : > { %v838_v27 = vadd.f32 %v2913_v32, %v837_v23 }
 0x1d9   : > { %1443 = vmatpush.bf16.msra.mxu2 %v2488_v22  ;;  %1431 = vmatpush.bf16.msrb.mxu3 %v2468_v33  ;;  %v840_v33 = vsel %vm839_vm9, %v2913_v32, %v838_v27 }
 0x1dd   : > { %1444 = vmatpush.bf16.msra.mxu2 %v2480_v28  ;;  %1432 = vmatpush.bf16.msrb.mxu3 %v2460_v39 }
 0x1e1   : > { %1445 = vmatpush.bf16.msra.mxu2 %v2472_v35  ;;  %1433 = vmatpush.bf16.msrb.mxu3 %v2452_v45 }
 0x1e5   : > { %1446 = vmatpush.bf16.msra.mxu2 %v2464_v41 }
 0x1e9   : > { %1447 = vmatpush.bf16.msra.mxu2 %v2456_v47 }
 0x1f1   : > { %v833_v34 = vpop.xlane.xlu0 %832 }
 0x1f2   : > { %v842_v35 = vmul.f32 %v840_v33, %v833_v34 }
 0x1f4   : > { %v844_v39 = vadd.f32 1e-06, %v842_v35 }
 0x1f6   : > { %2914 = vrsqrt.f32 %v844_v39  ;;  %vm861_vm12 = vweird.f32 %v844_v39 }
 0x1fc   : > { %v2915_v44 = vpop.eup %2914 }
 0x1fd   : > { %v856_v45 = vmul.f32 %v2915_v44, %v844_v39  ;;  %vm862_vm11 = vweird.f32 %v2915_v44 }
 0x1fe   : > { %vm863_vm13 = vmor %vm861_vm12, %vm862_vm11 }
 0x24d   : > { %v1497_v48 = vpop.f32.mrf.mxu0 }
 0x24e   : > { %1504 = vrot.lane.b32.xlu2 %v1497_v48, %s3273_s23  ;;  %v1521_v14 = vmul.f32 %v1519_v11, %v1497_v48 }
 0x253   : > { %v1324_v49 = vpop.f32.mrf.mxu2 }
 0x255   : > { %v1499_v50 = vpop.f32.mrf.mxu0 }
 0x256   : > { %1510 = vrot.lane.b32.xlu2 %v1497_v48, %s3274_s6  ;;  %1506 = vrot.lane.b32.xlu1 %v1499_v50, %s3273_s23  ;;  %v1522_v21 = vmul.f32 %v1520_v15, %v1499_v50  ;;  %v857_v48 = vmul.f32 %v2915_v44, %v856_v45 }
 0x25b   : > { %v1326_v51 = vpop.f32.mrf.mxu2 }
 0x25c   : > { %v1329_v52 = vpack.c.bf16 %v1326_v51, %v1324_v49 }
 0x25e   : > { %1512 = vrot.lane.b32.xlu1 %v1499_v50, %s3274_s6  ;;  %1434 = vmatmul.bf16.vlgmr.msrb.gmra.mxu3 %v1329_v52  ;;  %v858_v50 = vmul.f32 0.5, %v857_v48 }
 0x25f   : > { %1448 = vmatmul.bf16.vlgmr.msra.gmra.mxu2 %v1329_v52 }
 0x260   : > { %v859_v51 = vsub.f32 1.5, %v858_v50 }
 0x262   : > { %v860_v56 = vmul.f32 %v2915_v44, %v859_v51 }
 0x266   : > { %1046 = vrot.lane.b32.xlu1 %v1042_v54, %s3270_s1 }
 0x26e   : > { %1048 = vrot.lane.b32.xlu1 %v1043_v61, %s3270_s1  ;;  %v864_v61 = vsel %vm863_vm13, %v2915_v44, %v860_v56 }
 0x26f   : > { %v866_v0 = vmul.f32 %v864_v61, %v3651_v60 }
 0x276   : > { %1587 = vrot.lane.b32.xlu1 %v1073_v3, %s3270_s1 }
 0x27f   : > { %830 = vadd.xlane.f32.xlu2 %v828_v4 }
 0x2a8   : > { %v1505_v5 = vpop.permute.xlu2 %1504 }
 0x2b0   : > { %v1511_v10 = vpop.permute.xlu2 %1510 }
 0x2b1   : > { %v1517_v9 = vsel %vm1516_vm8, %v1505_v5, %v1511_v10  ;;  %v871_v10 = vmul.f32 %v2905_v1, %v866_v0 }
 0x2b2   : > { %v1525_v13 = vmul.f32 %v1523_v8, %v1517_v9 }
 0x2b4   : > { %v1527_v18 = vadd.f32 %v1525_v13, %v1521_v14 }
 0x2b6   : > { %v1529_v24 = vpack.c.bf16 %v1527_v18, %v1527_v18  ;;  %v1531_v18 = vlaneseq }
 0x2b8   : > { %v1540_v28 = vunpack.c.l.b16 %v1529_v24 }
 0x2c8   : > { %v1507_v7 = vpop.permute.xlu1 %1506 }
 0x2d0   : > { %v1513_v19 = vpop.permute.xlu1 %1512 }
 0x2d1   : > { %v1518_v20 = vsel %vm1516_vm8, %v1507_v7, %v1513_v19 }
 0x2d2   : > { %v1526_v22 = vmul.f32 %v1524_v16, %v1518_v20  ;;  %v1532_v20 = vshrl.u32 %v1531_v18, 7 }
 0x2d4   : > { %v1528_v25 = vadd.f32 %v1526_v22, %v1522_v21  ;;  %v1535_v21 = vand.u32 127, %v1531_v18 }
 0x2d6   : > { %v1530_v26 = vpack.c.bf16 %v1528_v25, %v1528_v25  ;;  %vm1536_vm1 = vcmp.le.s32.totalorder %v1535_v21, %v1532_v20 }
 0x2d8   : > { %v1541_v29 = vunpack.c.l.b16 %v1530_v26  ;;  %v1047_v30 = vpop.permute.xlu1 %1046 }
 0x2d9   : > { %v1052_v37 = vsub.f32 %v1032_v59, %v1047_v30 }
 0x2da   : > { %v1542_v31 = vpack.c.b16 %v1541_v29, %v1540_v28  ;;  %v1533_v28 = vadd.s32 8, %v1532_v20  ;;  %v2756_v20 = vld [vmem:[%s3771_s14 + $0x54] sm:$0xf0] }
 0x2dc   : > { %1692 = vrot.lane.b32.xlu2 %v1542_v31, %s3276_s12  ;;  %1584 = vrot.lane.b32.xlu1 %v1542_v31, %s3273_s23  ;;  %vm1537_vm2 = vcmp.le.s32.totalorder %v1535_v21, %v1533_v28  ;;  %v2755_v21 = vld [vmem:[%s3771_s14 + $0x54] sm:$0xf] }
 0x2e0   : > { %v1049_v36 = vpop.permute.xlu1 %1048 }
 0x2e1   : > { %v1053_v38 = vsub.f32 %v1033_v62, %v1049_v36  ;;  %v1435_v54 = vpop.f32.mrf.mxu3 }
 0x2e2   : > { %v1449_v55 = vpop.f32.mrf.mxu2 }
 0x2e3   : > { %v1054_v40 = vpack.c.bf16 %v1053_v38, %v1052_v37  ;;  %v1454_v8 = vpack.c.bf16 %v1449_v55, %v1435_v54 }
 0x2e4   : > { %1655 = vrot.lane.b32.xlu1 %v1542_v31, %s3270_s1 }
 0x2e5   : > { %v1548_v41 = vsel %vm1543_vm10, %v1054_v40, 0  ;;  %v1566_v60 = vunpack.c.l.b16 %v1454_v8  ;;  %v1674_v13 = vunpack.c.h.b16 %v1454_v8  ;;  %v2594_v8 = vld [vmem:[%s3771_s14 + $0x70] sm:$0xf] }
 0x2e6   : > { %1557 = vmatpush.bf16.xpose.msra.mxu1 %v1548_v41  ;;  %1667 = vmatpush.bf16.xpose.msrb.mxu2 %v1548_v41 }
 0x2e8   : > { %v1588_v42 = vpop.permute.xlu1 %1587 }
 0x2e9   : > { %v1593_v43 = vsel %vm1543_vm10, %v1588_v42, 0  ;;  %v1437_v3 = vpop.f32.mrf.mxu3 }
 0x2ea   : > { %1602 = vmatpush.bf16.xpose.msrb.mxu0 %v1593_v43  ;;  %v1451_v4 = vpop.f32.mrf.mxu2 }
 0x2eb   : > { %v1455_v7 = vpack.c.bf16 %v1451_v4, %v1437_v3 }
 0x2ed   : > { %2530 = vmatmul.msk.bf16.vlgmr.msra.gmra.mxu1 %vm1543_vm10, %v1542_v31  ;;  %v1567_v9 = vunpack.c.l.b16 %v1455_v7  ;;  %v1675_v12 = vunpack.c.h.b16 %v1455_v7 }
 0x2ef   : > { %v1568_v11 = vpack.c.b16 %v1567_v9, %v1566_v60  ;;  %v1676_v14 = vpack.c.b16 %v1675_v12, %v1674_v13  ;;  %v2760_v9 = vld [vmem:[%s3771_s14 + $0x74] sm:$0xf0]  ;;  %v2759_v60 = vld [vmem:[%s3771_s14 + $0x74] sm:$0xf]  ;;  %v2596_v12 = vld [vmem:[%s3771_s14 + $0x78] sm:$0xf0] }
 0x2f0   : > { %v2599_v13 = vor.u32 %v2759_v60, %v2596_v12  ;;  %v2540_v60 = vld [vmem:[%s3771_s14 + $0x8] sm:$0xf0] }
 0x2f2   : > { %1704 = vmatpush.bf16.xpose.msra.mxu0 %v1593_v43  ;;  %v831_v46 = vpop.xlane.xlu2 %830 }
 0x2f3   : > { %v841_v47 = vmul.f32 %v840_v33, %v831_v46 }
 0x2f5   : > { %v843_v49 = vadd.f32 1e-06, %v841_v47 }
 0x2f7   : > { %2916 = vrsqrt.f32 %v843_v49  ;;  %vm851_vm15 = vweird.f32 %v843_v49 }
 0x2fd   : > { %v2917_v52 = vpop.eup %2916 }
 0x2fe   : > { %v846_v53 = vmul.f32 %v2917_v52, %v843_v49  ;;  %vm852_vm14 = vweird.f32 %v2917_v52 }
 0x2ff   : > { %vm853_vm0 = vmor %vm851_vm15, %vm852_vm14 }
 0x300   : > { %v847_v58 = vmul.f32 %v2917_v52, %v846_v53 }
 0x302   : > { %v848_v59 = vmul.f32 0.5, %v847_v58 }
 0x304   : > { %v849_v62 = vsub.f32 1.5, %v848_v59 }
 0x306   : > { %v850_v63 = vmul.f32 %v2917_v52, %v849_v62 }
 0x308   : > { %v854_v2 = vsel %vm853_vm0, %v2917_v52, %v850_v63 }
 0x309   : > { %v865_v5 = vmul.f32 %v854_v2, %v3649_v57 }
 0x30b   : > { %v870_v6 = vmul.f32 %v2905_v1, %v865_v5 }
 0x30d   : > { %v1074_v32 = vpack.c.bf16 %v871_v10, %v870_v6 }
 0x30f   : > { %1577 = vmatpush.bf16.xpose.msra.mxu3 %v1074_v32  ;;  %1642 = vmatpush.bf16.msrb.mxu1 %v1074_v32 }
 0x313   : > { %1744 = vmatpush.bf16.msra.mxu1 %v1074_v32 }
 0x316   : > { %1578 = vmatmul.bf16.vlgmr.msra.gmra.mxu3 %v1568_v11  ;;  %v2595_v11 = vor.u32 %v2760_v9, %v2594_v8  ;;  %v2770_v8 = vld [vmem:[%s3771_s14 + $0xc4] sm:$0xf0]  ;;  %v2745_v9 = vld [vmem:[%s3771_s14 + $0x4] sm:$0xf] }
 0x317   : > { %1685 = vmatpush.bf16.xpose.msrb.mxu3 %v1074_v32  ;;  %v2543_v12 = vor.u32 %v2745_v9, %v2540_v60 }
 0x318   : > { %1961 = vmatpush.bf16.msra.mxu2 %v2595_v11 }
 0x326   : > { %1686 = vmatmul.bf16.vlgmr.msrb.gmra.mxu3 %v1676_v14  ;;  %v2586_v14 = vld [vmem:[%s3771_s14 + $0x60] sm:$0xf] }
 0x336   : > { %v1693_v16 = vpop.permute.xlu2 %1692 }
 0x34e   : > { %v1585_v15 = vpop.permute.xlu1 %1584 }
 0x34f   : > { %2531 = vmatmul.msk.bf16.vlgmr.msrb.gmra.mxu0 %vm1543_vm10, %v1585_v15  ;;  %v2758_v15 = vld [vmem:[%s3771_s14 + $0x64] sm:$0xf0] }
 0x350   : > { %1989 = vmatpush.bf16.msrb.mxu0 %v2599_v13  ;;  %v2769_v13 = vld [vmem:[%s3771_s14 + $0xc4] sm:$0xf] }
 0x356   : > { %v1656_v57 = vpop.permute.xlu1 %1655 }
 0x357   : > { %2533 = vmatmul.msk.bf16.vlgmr.msrb.gmra.mxu2 %vm1543_vm10, %v1656_v57  ;;  %v2757_v57 = vld [vmem:[%s3771_s14 + $0x64] sm:$0xf] }
 0x35f   : > { %2534 = vmatmul.msk.bf16.vlgmr.msra.gmra.mxu0 %vm1543_vm10, %v1693_v16  ;;  %v2587_v16 = vor.u32 %v2758_v15, %v2586_v14  ;;  %v2636_v14 = vld [vmem:[%s3771_s14 + $0xc8] sm:$0xf0] }
 0x360   : > { %v2639_v15 = vor.u32 %v2769_v13, %v2636_v14 }
 0x361   : > { %1962 = vmatpush.bf16.msra.mxu2 %v2587_v16  ;;  %v2768_v16 = vld [vmem:[%s3771_s14 + $0xb4] sm:$0xf0] }
 0x36a   : > { %v1559_v19 = vpop.f32.mrf.mxu1 }
 0x372   : > { %v1561_v29 = vpop.f32.mrf.mxu1 }
 0x399   : > { %v1579_v17 = vpop.f32.mrf.mxu3 }
 0x39a   : > { %v1580_v22 = vadd.f32 %v1579_v17, %v1559_v19  ;;  %v2588_v17 = vld [vmem:[%s3771_s14 + $0x68] sm:$0xf0]  ;;  %v2578_v19 = vld [vmem:[%s3771_s14 + $0x50] sm:$0xf] }
 0x39b   : > { %v2591_v18 = vor.u32 %v2757_v57, %v2588_v17  ;;  %v2626_v57 = vld [vmem:[%s3771_s14 + $0xb0] sm:$0xf]  ;;  %v2767_v17 = vld [vmem:[%s3771_s14 + $0xb4] sm:$0xf] }
 0x39d   : > { %1990 = vmatpush.bf16.msrb.mxu0 %v2591_v18  ;;  %v2627_v18 = vor.u32 %v2768_v16, %v2626_v57 }
 0x3a1   : > { %v1581_v25 = vpop.f32.mrf.mxu3 }
 0x3a2   : > { %v1582_v30 = vadd.f32 %v1581_v25, %v1561_v29  ;;  %v2570_v25 = vld [vmem:[%s3771_s14 + $0x40] sm:$0xf]  ;;  %v2572_v29 = vld [vmem:[%s3771_s14 + $0x48] sm:$0xf0] }
 0x3a9   : > { %v1687_v35 = vpop.f32.mrf.mxu3 }
 0x3b1   : > { %v1689_v43 = vpop.f32.mrf.mxu3 }
 0x3cc   : > { %v1604_v23 = vpop.f32.mrf.mxu0 }
 0x3cd   : > { %v1609_v24 = vadd.f32 %v1604_v23, %v1580_v22  ;;  %v2579_v22 = vor.u32 %v2756_v20, %v2578_v19  ;;  %v2580_v23 = vld [vmem:[%s3771_s14 + $0x58] sm:$0xf0] }
 0x3ce   : > { %v2628_v19 = vld [vmem:[%s3771_s14 + $0xb8] sm:$0xf0] }
 0x3cf   : > { %v1611_v26 = vsel %vm1536_vm1, %v1609_v24, -1e+30  ;;  %v2583_v24 = vor.u32 %v2755_v21, %v2580_v23  ;;  %1963 = vmatpush.bf16.msra.mxu2 %v2579_v22  ;;  %v2631_v20 = vor.u32 %v2767_v17, %v2628_v19  ;;  %v2618_v21 = vld [vmem:[%s3771_s14 + $0xa0] sm:$0xf]  ;;  %v2766_v22 = vld [vmem:[%s3771_s14 + $0xa4] sm:$0xf0] }
 0x3d0   : > { %v1613_v27 = vsel %vm1543_vm10, %v1611_v26, -inf  ;;  %v2765_v23 = vld [vmem:[%s3771_s14 + $0xa4] sm:$0xf] }
 0x3d1   : > { %1614 = vmax.xlane.f32.xlu0 %v1613_v27  ;;  %1991 = vmatpush.bf16.msrb.mxu0 %v2583_v24  ;;  %v2753_v27 = vld [vmem:[%s3771_s14 + $0x44] sm:$0xf]  ;;  %v2619_v24 = vor.u32 %v2766_v22, %v2618_v21 }
 0x3d4   : > { %v1606_v31 = vpop.f32.mrf.mxu0 }
 0x3d5   : > { %v1610_v33 = vadd.f32 %v1606_v31, %v1582_v30  ;;  %v2575_v30 = vor.u32 %v2753_v27, %v2572_v29  ;;  %v2562_v31 = vld [vmem:[%s3771_s14 + $0x30] sm:$0xf]  ;;  %v2763_v29 = vld [vmem:[%s3771_s14 + $0x94] sm:$0xf] }
 0x3d6   : > { %v2610_v27 = vld [vmem:[%s3771_s14 + $0x90] sm:$0xf] }
 0x3d7   : > { %v1612_v34 = vsel %vm1537_vm2, %v1610_v33, -1e+30  ;;  %1992 = vmatpush.bf16.msrb.mxu0 %v2575_v30  ;;  %v2752_v33 = vld [vmem:[%s3771_s14 + $0x34] sm:$0xf0] }
 0x3d8   : > { %v1616_v36 = vsel %vm1543_vm10, %v1612_v34, -inf }
 0x3d9   : > { %1617 = vmax.xlane.f32.xlu1 %v1616_v36  ;;  %v2776_v36 = vld [vmem:[%s3771_s14 + $0xf4] sm:$0xf0] }
 0x3da   : > { %v1669_v37 = vpop.f32.mrf.mxu2 }
 0x3db   : > { %v1688_v38 = vadd.f32 %v1687_v35, %v1669_v37  ;;  %v2563_v35 = vor.u32 %v2752_v33, %v2562_v31  ;;  %v2751_v37 = vld [vmem:[%s3771_s14 + $0x34] sm:$0xf]  ;;  %v2612_v31 = vld [vmem:[%s3771_s14 + $0x98] sm:$0xf0] }
 0x3dc   : > { %v1706_v39 = vpop.f32.mrf.mxu0  ;;  %v2615_v33 = vor.u32 %v2763_v29, %v2612_v31 }
 0x3dd   : > { %v1711_v40 = vadd.f32 %v1706_v39, %v1688_v38  ;;  %v2564_v38 = vld [vmem:[%s3771_s14 + $0x38] sm:$0xf0] }
 0x3df   : > { %v1713_v41 = vsel %vm1536_vm1, %v1711_v40, -1e+30  ;;  %v2567_v40 = vor.u32 %v2751_v37, %v2564_v38  ;;  %v2762_v37 = vld [vmem:[%s3771_s14 + $0x84] sm:$0xf0]  ;;  %v2761_v38 = vld [vmem:[%s3771_s14 + $0x84] sm:$0xf] }
 0x3e0   : > { %v1715_v42 = vsel %vm1543_vm10, %v1713_v41, -inf }
 0x3e1   : > { %1716 = vmax.xlane.f32.xlu0 %v1715_v42  ;;  %v2660_v42 = vld [vmem:[%s3771_s14 + $0xf8] sm:$0xf0]  ;;  %1993 = vmatpush.bf16.msrb.mxu0 %v2567_v40  ;;  %v2604_v40 = vld [vmem:[%s3771_s14 + $0x88] sm:$0xf0] }
 0x3e2   : > { %v1671_v44 = vpop.f32.mrf.mxu2 }
 0x3e3   : > { %v1690_v45 = vadd.f32 %v1689_v43, %v1671_v44  ;;  %v2554_v44 = vld [vmem:[%s3771_s14 + $0x20] sm:$0xf] }
 0x3e4   : > { %v1708_v46 = vpop.f32.mrf.mxu0 }
 0x3e5   : > { %v1712_v47 = vadd.f32 %v1708_v46, %v1690_v45  ;;  %v2750_v45 = vld [vmem:[%s3771_s14 + $0x24] sm:$0xf0]  ;;  %v2650_v46 = vld [vmem:[%s3771_s14 + $0xe0] sm:$0xf] }
 0x3e7   : > { %v1714_v48 = vsel %vm1537_vm2, %v1712_v47, -1e+30  ;;  %v2555_v47 = vor.u32 %v2750_v45, %v2554_v44 }
 0x3e8   : > { %v1718_v49 = vsel %vm1543_vm10, %v1714_v48, -inf }
 0x3e9   : > { %1719 = vmax.xlane.f32.xlu0 %v1718_v49  ;;  %v2749_v49 = vld [vmem:[%s3771_s14 + $0x24] sm:$0xf] }
 0x444   : > { %v1615_v50 = vpop.xlane.xlu0 %1614 }
 0x445   : > { %v1619_v51 = vsub.f32 %v1611_v26, %v1615_v50  ;;  %v2754_v26 = vld [vmem:[%s3771_s14 + $0x44] sm:$0xf0]  ;;  %v2556_v50 = vld [vmem:[%s3771_s14 + $0x28] sm:$0xf0] }
 0x446   : > { %v2571_v28 = vor.u32 %v2754_v26, %v2570_v25  ;;  %v2620_v25 = vld [vmem:[%s3771_s14 + $0xa8] sm:$0xf0] }
 0x447   : > { %v1621_v52 = vmul.f32 1.442695, %v1619_v51  ;;  %v2623_v26 = vor.u32 %v2765_v23, %v2620_v25 }
 0x448   : > { %1964 = vmatpush.bf16.msra.mxu2 %v2571_v28  ;;  %v2764_v28 = vld [vmem:[%s3771_s14 + $0x94] sm:$0xf0] }
 0x449   : > { %2918 = vpow2.f32 %v1621_v52  ;;  %v2559_v52 = vor.u32 %v2749_v49, %v2556_v50  ;;  %v2611_v30 = vor.u32 %v2764_v28, %v2610_v27 }
 0x44b   : > { %1994 = vmatpush.bf16.msrb.mxu0 %v2559_v52 }
 0x44c   : > { %v1618_v53 = vpop.xlane.xlu1 %1617  ;;  %1965 = vmatpush.bf16.msra.mxu2 %v2563_v35 }
 0x44d   : > { %v1620_v54 = vsub.f32 %v1612_v34, %v1618_v53  ;;  %v2658_v34 = vld [vmem:[%s3771_s14 + $0xf0] sm:$0xf]  ;;  %v2773_v53 = vld [vmem:[%s3771_s14 + $0xe4] sm:$0xf] }
 0x44e   : > { %v2659_v39 = vor.u32 %v2776_v36, %v2658_v34  ;;  %v2602_v36 = vld [vmem:[%s3771_s14 + $0x80] sm:$0xf] }
 0x44f   : > { %v2919_v55 = vpop.eup %2918  ;;  %v1623_v56 = vmul.f32 1.442695, %v1620_v54  ;;  %v2652_v54 = vld [vmem:[%s3771_s14 + $0xe8] sm:$0xf0] }
 0x450   : > { %v1625_v58 = vsel %vm1543_vm10, %v2919_v55, 0.0  ;;  %1975 = vmatpush.bf16.msra.mxu3 %v2659_v39  ;;  %1966 = vmatpush.bf16.msra.mxu2 %v2555_v47  ;;  %v2603_v39 = vor.u32 %v2762_v37, %v2602_v36 }
 0x451   : > { %2920 = vpow2.f32 %v1623_v56  ;;  %1626 = vadd.xlane.f32.xlu2 %v1625_v58  ;;  %v2546_v56 = vld [vmem:[%s3771_s14 + $0x10] sm:$0xf]  ;;  %v2748_v58 = vld [vmem:[%s3771_s14 + $0x14] sm:$0xf0] }
 0x454   : > { %v1717_v59 = vpop.xlane.xlu0 %1716 }
 0x455   : > { %v1721_v61 = vsub.f32 %v1713_v41, %v1717_v59  ;;  %v2775_v41 = vld [vmem:[%s3771_s14 + $0xf4] sm:$0xf]  ;;  %v2642_v59 = vld [vmem:[%s3771_s14 + $0xd0] sm:$0xf] }
 0x456   : > { %v2663_v43 = vor.u32 %v2775_v41, %v2660_v42  ;;  %v2607_v41 = vor.u32 %v2761_v38, %v2604_v40 }
 0x457   : > { %v2921_v62 = vpop.eup %2920  ;;  %v1723_v63 = vmul.f32 1.442695, %v1721_v61  ;;  %v2547_v61 = vor.u32 %v2748_v58, %v2546_v56 }
 0x458   : > { %v1631_v0 = vpack.c.bf16 %v2921_v62, %v2919_v55  ;;  %v1628_v1 = vsel %vm1543_vm10, %v2921_v62, 0.0  ;;  %v2655_v55 = vor.u32 %v2773_v53, %v2652_v54  ;;  %v2772_v62 = vld [vmem:[%s3771_s14 + $0xd4] sm:$0xf0] }
 0x459   : > { %2922 = vpow2.f32 %v1723_v63  ;;  %1629 = vadd.xlane.f32.xlu0 %v1628_v1  ;;  %v2747_v63 = vld [vmem:[%s3771_s14 + $0x14] sm:$0xf]  ;;  %v2643_v1 = vor.u32 %v2772_v62, %v2642_v59  ;;  %1967 = vmatpush.bf16.msra.mxu2 %v2547_v61 }
 0x45a   : > { %2532 = vmatmul.msk.bf16.vlgmr.msrb.gmra.mxu1 %vm1543_vm10, %v1631_v0  ;;  %v2548_v0 = vld [vmem:[%s3771_s14 + $0x18] sm:$0xf0] }
 0x45b   : > { %2003 = vmatpush.bf16.msrb.mxu1 %v2663_v43 }
 0x45c   : > { %v1720_v2 = vpop.xlane.xlu0 %1719 }
 0x45d   : > { %v1722_v3 = vsub.f32 %v1714_v48, %v1720_v2  ;;  %v2774_v48 = vld [vmem:[%s3771_s14 + $0xe4] sm:$0xf0]  ;;  %v2551_v2 = vor.u32 %v2747_v63, %v2548_v0 }
 0x45e   : > { %v2651_v51 = vor.u32 %v2774_v48, %v2650_v46 }
 0x45f   : > { %v2923_v4 = vpop.eup %2922  ;;  %v1725_v5 = vmul.f32 1.442695, %v1722_v3  ;;  %2004 = vmatpush.bf16.msrb.mxu1 %v2655_v55  ;;  %v2771_v3 = vld [vmem:[%s3771_s14 + $0xd4] sm:$0xf]  ;;  %1995 = vmatpush.bf16.msrb.mxu0 %v2551_v2 }
 0x460   : > { %v1727_v6 = vsel %vm1543_vm10, %v2923_v4, 0.0  ;;  %1976 = vmatpush.bf16.msra.mxu3 %v2651_v51 }
 0x461   : > { %2924 = vpow2.f32 %v1725_v5  ;;  %1728 = vadd.xlane.f32.xlu0 %v1727_v6  ;;  %v2538_v6 = vld [vmem:[%s3771_s14] sm:$0xf] }
 0x463   : > { %1996 = vmatpush.bf16.msrb.mxu0 %v2543_v12 }
 0x464   : > { %1977 = vmatpush.bf16.msra.mxu3 %v2643_v1 }
 0x467   : > { %v2925_v10 = vpop.eup %2924 }
 0x468   : > { %v1733_v7 = vpack.c.bf16 %v2925_v10, %v2923_v4  ;;  %v1730_v32 = vsel %vm1543_vm10, %v2925_v10, 0.0  ;;  %v2644_v4 = vld [vmem:[%s3771_s14 + $0xd8] sm:$0xf0]  ;;  %v2746_v10 = vld [vmem:[%s3771_s14 + $0x4] sm:$0xf0] }
 0x469   : > { %1731 = vadd.xlane.f32.xlu0 %v1730_v32  ;;  %v2647_v5 = vor.u32 %v2771_v3, %v2644_v4  ;;  %v2539_v32 = vor.u32 %v2746_v10, %v2538_v6 }
 0x46a   : > { %2535 = vmatmul.msk.bf16.vlgmr.msra.gmra.mxu1 %vm1543_vm10, %v1733_v7  ;;  %v2634_v7 = vld [vmem:[%s3771_s14 + $0xc0] sm:$0xf] }
 0x46b   : > { %2005 = vmatpush.bf16.msrb.mxu1 %v2647_v5  ;;  %v2635_v11 = vor.u32 %v2770_v8, %v2634_v7  ;;  %1968 = vmatpush.bf16.msra.mxu2 %v2539_v32 }
 0x46d   : > { %1978 = vmatpush.bf16.msra.mxu3 %v2635_v11 }
 0x46f   : > { %2006 = vmatpush.bf16.msrb.mxu1 %v2639_v15 }
 0x471   : > { %1979 = vmatpush.bf16.msra.mxu3 %v2627_v18 }
 0x473   : > { %2007 = vmatpush.bf16.msrb.mxu1 %v2631_v20 }
 0x475   : > { %1980 = vmatpush.bf16.msra.mxu3 %v2619_v24 }
 0x477   : > { %2008 = vmatpush.bf16.msrb.mxu1 %v2623_v26 }
 0x479   : > { %1981 = vmatpush.bf16.msra.mxu3 %v2611_v30 }
 0x47b   : > { %2009 = vmatpush.bf16.msrb.mxu1 %v2615_v33 }
 0x47d   : > { %1982 = vmatpush.bf16.msra.mxu3 %v2603_v39 }
 0x47f   : > { %2010 = vmatpush.bf16.msrb.mxu1 %v2607_v41 }
 0x4c4   : > { %v1627_v34 = vpop.xlane.xlu2 %1626 }
 0x4c5   : > { %2926 = vrcp.f32 %v1627_v34 }
 0x4cb   : > { %v2927_v43 = vpop.eup %2926 }
 0x4cc   : > { %v1630_v35 = vpop.xlane.xlu0 %1629 }
 0x4cd   : > { %2928 = vrcp.f32 %v1630_v35 }
 0x4d3   : > { %v2929_v46 = vpop.eup %2928 }
 0x4d4   : > { %v1729_v44 = vpop.xlane.xlu0 %1728 }
 0x4d5   : > { %2930 = vrcp.f32 %v1729_v44 }
 0x4d7   : > { %v1644_v42 = vpop.f32.mrf.mxu1 }
 0x4d8   : > { %v1651_v45 = vmul.f32 %v2927_v43, %v1644_v42 }
 0x4da   : > { %v1653_v48 = vpack.c.bf16 %v1651_v45, %v1651_v45 }
 0x4db   : > { %v2931_v56 = vpop.eup %2930 }
 0x4dc   : > { %v1759_v51 = vunpack.c.l.b16 %v1653_v48  ;;  %v1732_v53 = vpop.xlane.xlu0 %1731 }
 0x4dd   : > { %2932 = vrcp.f32 %v1732_v53 }
 0x4df   : > { %v1646_v47 = vpop.f32.mrf.mxu1 }
 0x4e0   : > { %v1652_v49 = vmul.f32 %v2929_v46, %v1646_v47 }
 0x4e2   : > { %v1654_v50 = vpack.c.bf16 %v1652_v49, %v1652_v49 }
 0x4e3   : > { %v2933_v59 = vpop.eup %2932 }
 0x4e4   : > { %v1760_v52 = vunpack.c.l.b16 %v1654_v50 }
 0x4e6   : > { %v1761_v54 = vpack.c.b16 %v1760_v52, %v1759_v51 }
 0x4e7   : > { %v1746_v55 = vpop.f32.mrf.mxu1 }
 0x4e8   : > { %1969 = vmatmul.bf16.vlgmr.msra.gmra.mxu2 %v1761_v54  ;;  %1997 = vmatmul.bf16.vlgmr.msrb.gmra.mxu0 %v1761_v54  ;;  %v1753_v58 = vmul.f32 %v2931_v56, %v1746_v55 }
 0x4ea   : > { %v1755_v62 = vpack.c.bf16 %v1753_v58, %v1753_v58 }
 0x4ec   : > { %v1765_v1 = vunpack.c.l.b16 %v1755_v62 }
 0x4ef   : > { %v1748_v61 = vpop.f32.mrf.mxu1 }
 0x4f0   : > { %v1754_v63 = vmul.f32 %v2933_v59, %v1748_v61 }
 0x4f2   : > { %v1756_v0 = vpack.c.bf16 %v1754_v63, %v1754_v63 }
 0x4f4   : > { %v1766_v2 = vunpack.c.l.b16 %v1756_v0 }
 0x4f6   : > { %v1767_v3 = vpack.c.b16 %v1766_v2, %v1765_v1 }
 0x4f8   : > { %1983 = vmatmul.bf16.vlgmr.msra.gmra.mxu3 %v1767_v3  ;;  %2011 = vmatmul.bf16.vlgmr.msrb.gmra.mxu1 %v1767_v3 }
 0x565   : > { %v1998_v4 = vpop.f32.mrf.mxu0 }
 0x56b   : > { %v1970_v10 = vpop.f32.mrf.mxu2 }
 0x56d   : > { %v2000_v8 = vpop.f32.mrf.mxu0 }
 0x573   : > { %v1972_v11 = vpop.f32.mrf.mxu2 }
 0x575   : > { %v2012_v5 = vpop.f32.mrf.mxu1 }
 0x576   : > { %v2013_v6 = vadd.f32 %v2012_v5, %v1998_v4 }
 0x578   : > { %2018 = vst [vmem:[%s653_s2 + $0x8] sm:$0xff] %v2013_v6 }
 0x57b   : > { %v1984_v7 = vpop.f32.mrf.mxu3 }
 0x57c   : > { %v1985_v32 = vadd.f32 %v1984_v7, %v1970_v10 }
 0x57d   : > { %v2014_v9 = vpop.f32.mrf.mxu1 }
 0x57e   : > { %2017 = vst [vmem:[%s653_s2] sm:$0xff] %v1985_v32  ;;  %v2015_v60 = vadd.f32 %v2014_v9, %v2000_v8 }
 0x580   : > { %2020 = vst [vmem:[%s653_s2 + $0x18] sm:$0xff] %v2015_v60 }
 0x583   : > { %v1986_v12 = vpop.f32.mrf.mxu3 }
 0x584   : > { %v1987_v13 = vadd.f32 %v1986_v12, %v1972_v11 }
 0x586   : > { %2019 = vst [vmem:[%s653_s2 + $0x10] sm:$0xff] %v1987_v13 }
 0x587   : > { %3201 = shalt.err (!%p3198_p5)
}
 0x588   : > { %s3277_s7 = smov 256  }
 0x589   : > { %2806 = dma.vmem_to_hbm [thread:$0]  (%p3439_p0), %s2035_s9, 512, %s2037_s3, %s2022_s20, %s3277_s7, %s3277_s7, %s3271_s22  }
 0x58a PF: > { %s3949_s12 = sld [smem:[#allocation22_spill]]  ;;  %p3951_p9 = scmp.ge.s32.totalorder %s3256_s16, 2 }
 0x58c   : > { %p2835_p7 = pnand %p3951_p9, %p3443_p4 }
 0x58e   : > { %p2836_p3 = pneg %p2835_p7 }
 0x590   : > { %s2051_s28 = sand.u32 1, %s3949_s12  }
 0x591   : > { %s2052_s18 = scalar_lea.sflag [#allocation4], %s2051_s28 }
 0x592   : > { %3239 = dma.done.wait (%p2836_p3), %s2052_s18, 512  }
 0x593   : > { %3241 = vsyncadd (%p2836_p3), %s2052_s18, 4294966784  ;;  %s3952_s16 = sld [smem:[#allocation23_spill]]  ;;  %s3954_s29 = smov %s3248_s30 }
 0x594   : > { %s3953_s14 = sld [smem:[#allocation24_spill]]  ;;  %s3955_s30 = smov %s3252_s15 }
 0x599   : > { %p28_p6 = scmp.ge.s32.totalorder %s3952_s16, 4  }
 0x59a   : > { %s3956_s15 = smov %s3953_s14 }
 0x59b   :  { %30 = sbr.rel (!%p28_p6) target bundleno = 20 (0x14), region = 161 }
 0x5a0   :  { %2058 = vsyncpa [#allocation3], 1 }
 0x5a1   :  { %2060 = vsyncpa [#allocation3 + $0x1], 1 }
 0x5a2   :  { %2061 = vsyncpa [#allocation6], 1 }
 0x5a3   :  { %2062 = vsyncpa [#allocation9], 1 }
 0x5a4   :  { %2063 = vsyncpa [#allocation12], 1 }
 0x5a5   :  { %2064 = vsyncpa [#allocation4], 1 }
 0x5a6   :  { %2066 = vsyncpa [#allocation4 + $0x1], 1 }

</bundles_post_ra>
